<compile_context>
chip_gen: v7x
topology: tpu7x:2x2x1
jax: 0.10.0
libtpu: 0.0.40
codegen_flags: <defaults>
</compile_context>

<pallas_src>
import functools

import jax
import jax.numpy as jnp
from jax.experimental import pallas as pl
from jax.experimental.pallas import tpu as pltpu


# ----------------------------------------------------------------------------
# Plain-JAX glue: FPS, ball query, gathers (index-heavy, no Pallas hot path)
# ----------------------------------------------------------------------------
def furthest_point_sample(xyz, npoint):
    """xyz: (B, N, 3) -> (B, npoint) int32 indices (CUDA FPS semantics, start at 0)."""
    B, N, _ = xyz.shape
    inds = jnp.zeros((B, npoint), dtype=jnp.int32)
    dists = jnp.full((B, N), 1e10, dtype=jnp.float32)
    farthest = jnp.zeros((B,), dtype=jnp.int32)

    def body(i, carry):
        inds, dists, farthest = carry
        inds = inds.at[:, i].set(farthest)
        centroid = jnp.take_along_axis(xyz, farthest[:, None, None], axis=1)  # (B,1,3)
        d = jnp.sum((xyz - centroid) ** 2, axis=-1)                            # (B,N)
        dists = jnp.minimum(dists, d)
        farthest = jnp.argmax(dists, axis=-1).astype(jnp.int32)
        return inds, dists, farthest

    inds, _, _ = jax.lax.fori_loop(0, npoint, body, (inds, dists, farthest))
    return inds


def ball_query(radius, nsample, xyz, new_xyz):
    """xyz: (B, N, 3), new_xyz: (B, S, 3) -> (B, S, nsample) int32.

    Uses a masked top_k (k = nsample) instead of a full O(N log N) sort over N.
    """
    B, N, _ = xyz.shape
    sqr = jnp.sum((new_xyz[:, :, None, :] - xyz[:, None, :, :]) ** 2, axis=-1)  # (B,S,N)
    mask = sqr < radius * radius
    arange = jnp.arange(N, dtype=jnp.int32)
    # valid -> -index (larger value == smaller index), invalid -> -N sentinel
    key = jnp.where(mask, -arange[None, None, :], -N)
    vals, _ = jax.lax.top_k(key, nsample)          # descending -> ascending indices
    idx = -vals                                    # invalid -> N
    first = idx[:, :, :1]
    first = jnp.where(first == N, 0, first)        # empty ball -> index 0
    idx = jnp.where(idx == N, first, idx)
    return idx.astype(jnp.int32)


def gather_points(points, idx):
    """points: (B, N, C), idx: (B, ...) -> (B, ..., C)."""
    return jax.vmap(lambda p, i: p[i])(points, idx)


# ----------------------------------------------------------------------------
# Pallas kernel: fused pointwise MLP + maxpool + proposal mlp_module
# ----------------------------------------------------------------------------
def _fused_kernel(x_ref,
                  w1_ref, b1_ref, w2_ref, b2_ref, w3_ref, b3_ref,
                  wa_ref, ba_ref, wb_ref, bb_ref,
                  out_ref, *, nsample):
    """x_ref: (TQ*nsample, Cin) bf16  ->  out_ref: (TQ, Cout) f32."""

    def layer(h, w_ref, b_ref):
        # bf16 x bf16 MXU matmul, f32 accumulation; shift + ReLU done on the
        # f32 accumulator (v5e's VPU has no bf16 math).
        y = jnp.dot(h, w_ref[...], preferred_element_type=jnp.float32)
        return jnp.maximum(y + b_ref[...], 0.0)

    h = x_ref[...]                                         # (TQ*ns, Cin) bf16
    h = layer(h, w1_ref, b1_ref).astype(jnp.bfloat16)      # shared MLP layer 1
    h = layer(h, w2_ref, b2_ref).astype(jnp.bfloat16)      # shared MLP layer 2
    h = layer(h, w3_ref, b3_ref).astype(jnp.bfloat16)      # shared MLP layer 3
    c = h.shape[-1]
    tq = h.shape[0] // nsample
    # nsample is a multiple of 8, so this reshape is layout-preserving and the
    # max lowers to a cheap sublane-strided reduce.
    h = h.reshape(tq, nsample, c).max(axis=1)              # max-pool over ball
    h = layer(h, wa_ref, ba_ref).astype(jnp.bfloat16)      # mlp_module layer 1
    h = layer(h, wb_ref, bb_ref)                           # mlp_module layer 2 (f32)
    out_ref[...] = h.astype(out_ref.dtype)                 # (TQ, Cout) f32


def _pick_tq(total_q, cap=256):
    """Largest proposal tile <= cap that divides total_q (multiple of 8 if tiled)."""
    if total_q <= cap:
        return total_q
    for t in range(cap, 0, -1):
        if total_q % t == 0 and t % 8 == 0:
            return t
    return total_q  # fallback: single tile


def fused_proposal_mlp(x, flat_params, total_q, nsample):
    """x: (total_q*nsample, Cin) bf16 -> (total_q, Cout) f32."""
    rows, cin = x.shape
    assert rows == total_q * nsample
    cout = flat_params[-2].shape[-1]                 # last weight matrix
    tq = _pick_tq(total_q)
    grid = (total_q // tq,)

    kernel = functools.partial(_fused_kernel, nsample=nsample)

    in_specs = [pl.BlockSpec((tq * nsample, cin), lambda i: (i, 0))]
    # Weights / shifts: whole-array blocks with constant index maps (10 arrays
    # after folding the BN scale into W).  They could additionally be
    # single-buffered via pipeline_mode=pl.Buffered(1); kept default for
    # maximum portability — they are tiny in bf16.
    for p in flat_params:
        in_specs.append(pl.BlockSpec(p.shape, lambda i: (0, 0)))

    return pl.pallas_call(
        kernel,
        out_shape=jax.ShapeDtypeStruct((total_q, cout), jnp.float32),
        grid=grid,
        in_specs=in_specs,
        out_specs=pl.BlockSpec((tq, cout), lambda i: (i, 0)),
        compiler_params=pltpu.CompilerParams(
            dimension_semantics=("parallel",),
            vmem_limit_bytes=64 * 1024 * 1024,
        ),
    )(x, *flat_params)


# ----------------------------------------------------------------------------
# Parameter construction: Conv(1x1)+bias followed by eval-mode BatchNorm,
# folded so the BN scale is absorbed into the weight (W' = W * scale) and only
# a per-channel shift remains for the epilogue. Weights stored in bf16.
# ----------------------------------------------------------------------------
def make_folded_layer(key, cin, cout):
    kw, kb = jax.random.split(key)
    w = jax.random.normal(kw, (cin, cout), jnp.float32) / jnp.sqrt(jnp.float32(cin))
    b = jax.random.normal(kb, (cout,), jnp.float32) * 0.01
    gamma = jnp.ones((cout,), jnp.float32)
    beta = jnp.zeros((cout,), jnp.float32)
    running_mean = jnp.zeros((cout,), jnp.float32)
    running_var = jnp.ones((cout,), jnp.float32)
    eps = 1e-5
    scale = gamma / jnp.sqrt(running_var + eps)
    w_folded = (w * scale[None, :]).astype(jnp.bfloat16)
    shift = (beta + (b - running_mean) * scale).reshape(1, cout)  # f32
    return w_folded, shift


# ----------------------------------------------------------------------------
# Full ProposalGenerator forward
# ----------------------------------------------------------------------------
def proposal_generator_forward(vote_xyz, vote_features, flat_params, *,
                               num_proposal, radius, nsample, normalize_xyz=True):
    """
    vote_xyz:      (B, N, 3)  float32
    vote_features: (B, C, N)  float32  (PyTorch channel-first)
    returns (new_xyz (B, num_proposal, 3),
             features (B, proposal_feat_dim, num_proposal),
             fps_inds (B, num_proposal))
    """
    B, N, _ = vote_xyz.shape
    assert nsample % 8 == 0, "nsample must be a multiple of 8 (layout-preserving pool)"

    # --- vote_aggregation: sampling + grouping (glue) ---
    fps_inds = furthest_point_sample(vote_xyz, num_proposal)             # (B, S)
    new_xyz = gather_points(vote_xyz, fps_inds)                          # (B, S, 3)
    idx = ball_query(radius, nsample, vote_xyz, new_xyz)                 # (B, S, K)

    grouped_xyz = gather_points(vote_xyz, idx) - new_xyz[:, :, None, :]  # (B, S, K, 3)
    if normalize_xyz:
        grouped_xyz = grouped_xyz / radius
    feats_t = jnp.transpose(vote_features, (0, 2, 1))                    # (B, N, C)
    grouped_feat = gather_points(feats_t, idx)                           # (B, S, K, C)
    # TODO(synk): fold this gather + concat into the Pallas kernel via
    #             PrefetchScalarGridSpec row-gather to avoid materializing
    #             (B, S, K, 3+C) in HBM at large N.
    grouped = jnp.concatenate([grouped_xyz, grouped_feat], axis=-1)      # (B, S, K, 3+C)

    # Fold batch into the matmul M dimension; bf16 activations for the MXU.
    x = grouped.reshape(B * num_proposal * nsample, grouped.shape[-1])
    x = x.astype(jnp.bfloat16)

    # --- hot path in Pallas: shared MLP + max-pool + mlp_module ---
    out = fused_proposal_mlp(x, flat_params, B * num_proposal, nsample)  # (B*S, Cout)

    features = jnp.transpose(out.reshape(B, num_proposal, -1), (0, 2, 1))  # (B, Cout, S)
    return new_xyz, features, fps_inds


# Pure JAX reference for the fused kernel (same bf16 weights / f32 accumulation).
def _reference_mlp(x, flat_params, nsample):
    (w1, b1, w2, b2, w3, b3, wa, ba, wb, bb) = flat_params

    def layer(h, w, b):
        y = jnp.dot(h, w, preferred_element_type=jnp.float32)
        return jnp.maximum(y + b, 0.0)

    h = layer(x, w1, b1).astype(jnp.bfloat16)
    h = layer(h, w2, b2).astype(jnp.bfloat16)
    h = layer(h, w3, b3).astype(jnp.bfloat16)
    h = h.reshape(-1, nsample, h.shape[-1]).max(axis=1)
    h = layer(h, wa, ba).astype(jnp.bfloat16)
    h = layer(h, wb, bb)
    return h


if __name__ == "__main__":
    # Small, module-consistent shapes.
    B = 2
    N_SEED = 64            # number of votes
    SEED_FEAT_DIM = 32     # seed/vote feature channels (small stand-in)
    NUM_PROPOSAL = 16      # num_proposal (small)
    NSAMPLE = 16           # ball-query nsample (module default, multiple of 8)
    PROPOSAL_FEAT_DIM = 128
    RADIUS = 0.3

    key = jax.random.PRNGKey(0)
    k_xyz, k_feat, k1, k2, k3, ka, kb = jax.random.split(key, 7)

    vote_xyz = jax.random.uniform(k_xyz, (B, N_SEED, 3), jnp.float32,
                                  minval=-0.5, maxval=0.5)
    vote_features = jax.random.normal(k_feat, (B, SEED_FEAT_DIM, N_SEED), jnp.float32)

    # Shared MLP:  [3 + seed_feat_dim, 128, 128, proposal_feat_dim]
    # mlp_module:  [proposal_feat_dim, 128, proposal_feat_dim]
    cin = 3 + SEED_FEAT_DIM
    p1 = make_folded_layer(k1, cin, 128)
    p2 = make_folded_layer(k2, 128, 128)
    p3 = make_folded_layer(k3, 128, PROPOSAL_FEAT_DIM)
    pa = make_folded_layer(ka, PROPOSAL_FEAT_DIM, 128)
    pb = make_folded_layer(kb, 128, PROPOSAL_FEAT_DIM)
    flat_params = [t for layer in (p1, p2, p3, pa, pb) for t in layer]

    fwd = jax.jit(functools.partial(
        proposal_generator_forward,
        num_proposal=NUM_PROPOSAL, radius=RADIUS, nsample=NSAMPLE))

    new_xyz, features, fps_inds = fwd(vote_xyz, vote_features, flat_params)
    jax.block_until_ready((new_xyz, features, fps_inds))

    assert new_xyz.shape == (B, NUM_PROPOSAL, 3)
    assert features.shape == (B, PROPOSAL_FEAT_DIM, NUM_PROPOSAL)
    assert fps_inds.shape == (B, NUM_PROPOSAL)

    # Sanity-check the Pallas hot path against a pure-JAX reference
    # (tolerance relaxed for bf16 activations/weights; accumulation is f32).
    fps_i = furthest_point_sample(vote_xyz, NUM_PROPOSAL)
    nx = gather_points(vote_xyz, fps_i)
    idx = ball_query(RADIUS, NSAMPLE, vote_xyz, nx)
    gx = (gather_points(vote_xyz, idx) - nx[:, :, None, :]) / RADIUS
    gf = gather_points(jnp.transpose(vote_features, (0, 2, 1)), idx)
    x_in = jnp.concatenate([gx, gf], axis=-1).reshape(
        B * NUM_PROPOSAL * NSAMPLE, cin).astype(jnp.bfloat16)
    ref = _reference_mlp(x_in, flat_params, NSAMPLE).reshape(B, NUM_PROPOSAL, -1)
    got = jnp.transpose(features, (0, 2, 1))
    assert jnp.allclose(got, ref, atol=2e-2, rtol=2e-2), "Pallas vs JAX mismatch"

    print("KERNEL_OK")
</pallas_src>

<mosaic_0001>
module attributes {stable_mosaic.version = 11 : i64} {
  func.func @_fused_kernel(%arg0: i32, %arg1: memref<512x35xbf16, #tpu.memory_space<vmem>>, %arg2: memref<35x128xbf16, #tpu.memory_space<vmem>>, %arg3: memref<1x128xf32, #tpu.memory_space<vmem>>, %arg4: memref<128x128xbf16, #tpu.memory_space<vmem>>, %arg5: memref<1x128xf32, #tpu.memory_space<vmem>>, %arg6: memref<128x128xbf16, #tpu.memory_space<vmem>>, %arg7: memref<1x128xf32, #tpu.memory_space<vmem>>, %arg8: memref<128x128xbf16, #tpu.memory_space<vmem>>, %arg9: memref<1x128xf32, #tpu.memory_space<vmem>>, %arg10: memref<128x128xbf16, #tpu.memory_space<vmem>>, %arg11: memref<1x128xf32, #tpu.memory_space<vmem>>, %arg12: memref<32x128xf32, #tpu.memory_space<vmem>>) attributes {dimension_semantics = [#tpu.dimension_semantics<parallel>], iteration_bounds = array<i64: 1>, scalar_prefetch = 0 : i64, scratch_operands = 0 : i64, tpu.core_type = #tpu.core_type<tc>, window_params = [{transform_indices = @transform_0, window_bounds = array<i64: 512, 35>}, {pipeline_mode = #tpu.pipeline_mode<synchronous>, transform_indices = @transform_1, window_bounds = array<i64: 35, 128>}, {pipeline_mode = #tpu.pipeline_mode<synchronous>, transform_indices = @transform_2, window_bounds = array<i64: 1, 128>}, {pipeline_mode = #tpu.pipeline_mode<synchronous>, transform_indices = @transform_3, window_bounds = array<i64: 128, 128>}, {pipeline_mode = #tpu.pipeline_mode<synchronous>, transform_indices = @transform_4, window_bounds = array<i64: 1, 128>}, {pipeline_mode = #tpu.pipeline_mode<synchronous>, transform_indices = @transform_5, window_bounds = array<i64: 128, 128>}, {pipeline_mode = #tpu.pipeline_mode<synchronous>, transform_indices = @transform_6, window_bounds = array<i64: 1, 128>}, {pipeline_mode = #tpu.pipeline_mode<synchronous>, transform_indices = @transform_7, window_bounds = array<i64: 128, 128>}, {pipeline_mode = #tpu.pipeline_mode<synchronous>, transform_indices = @transform_8, window_bounds = array<i64: 1, 128>}, {pipeline_mode = #tpu.pipeline_mode<synchronous>, transform_indices = @transform_9, window_bounds = array<i64: 128, 128>}, {pipeline_mode = #tpu.pipeline_mode<synchronous>, transform_indices = @transform_10, window_bounds = array<i64: 1, 128>}, {transform_indices = @transform_11, window_bounds = array<i64: 32, 128>}]} {
    %c0 = arith.constant 0 : index
    %c0_0 = arith.constant 0 : index
    %0 = vector.load %arg1[%c0, %c0_0] : memref<512x35xbf16, #tpu.memory_space<vmem>>, vector<512x35xbf16>
    %c0_1 = arith.constant 0 : index
    %c0_2 = arith.constant 0 : index
    %1 = vector.load %arg2[%c0_1, %c0_2] : memref<35x128xbf16, #tpu.memory_space<vmem>>, vector<35x128xbf16>
    %cst = arith.constant dense<0.000000e+00> : vector<512x128xf32>
    %2 = tpu.matmul %0, %1, %cst {dimension_numbers = #tpu.dot_dimension_numbers<[1], [0], [0], [1], [0, 0, 1, 1], [], []>} : vector<512x35xbf16>, vector<35x128xbf16>, vector<512x128xf32> -> vector<512x128xf32>
    %c0_3 = arith.constant 0 : index
    %c0_4 = arith.constant 0 : index
    %3 = vector.load %arg3[%c0_3, %c0_4] : memref<1x128xf32, #tpu.memory_space<vmem>>, vector<1x128xf32>
    %4 = vector.broadcast %3 : vector<1x128xf32> to vector<512x128xf32>
    %5 = arith.addf %2, %4 : vector<512x128xf32>
    %cst_5 = arith.constant 0.000000e+00 : f32
    %6 = vector.broadcast %cst_5 : f32 to vector<512x128xf32>
    %7 = arith.maximumf %5, %6 : vector<512x128xf32>
    %8 = arith.truncf %7 : vector<512x128xf32> to vector<512x128xbf16>
    %c0_6 = arith.constant 0 : index
    %c0_7 = arith.constant 0 : index
    %9 = vector.load %arg4[%c0_6, %c0_7] : memref<128x128xbf16, #tpu.memory_space<vmem>>, vector<128x128xbf16>
    %cst_8 = arith.constant dense<0.000000e+00> : vector<512x128xf32>
    %10 = tpu.matmul %8, %9, %cst_8 {dimension_numbers = #tpu.dot_dimension_numbers<[1], [0], [0], [1], [0, 0, 1, 1], [], []>} : vector<512x128xbf16>, vector<128x128xbf16>, vector<512x128xf32> -> vector<512x128xf32>
    %c0_9 = arith.constant 0 : index
    %c0_10 = arith.constant 0 : index
    %11 = vector.load %arg5[%c0_9, %c0_10] : memref<1x128xf32, #tpu.memory_space<vmem>>, vector<1x128xf32>
    %12 = vector.broadcast %11 : vector<1x128xf32> to vector<512x128xf32>
    %13 = arith.addf %10, %12 : vector<512x128xf32>
    %cst_11 = arith.constant 0.000000e+00 : f32
    %14 = vector.broadcast %cst_11 : f32 to vector<512x128xf32>
    %15 = arith.maximumf %13, %14 : vector<512x128xf32>
    %16 = arith.truncf %15 : vector<512x128xf32> to vector<512x128xbf16>
    %c0_12 = arith.constant 0 : index
    %c0_13 = arith.constant 0 : index
    %17 = vector.load %arg6[%c0_12, %c0_13] : memref<128x128xbf16, #tpu.memory_space<vmem>>, vector<128x128xbf16>
    %cst_14 = arith.constant dense<0.000000e+00> : vector<512x128xf32>
    %18 = tpu.matmul %16, %17, %cst_14 {dimension_numbers = #tpu.dot_dimension_numbers<[1], [0], [0], [1], [0, 0, 1, 1], [], []>} : vector<512x128xbf16>, vector<128x128xbf16>, vector<512x128xf32> -> vector<512x128xf32>
    %c0_15 = arith.constant 0 : index
    %c0_16 = arith.constant 0 : index
    %19 = vector.load %arg7[%c0_15, %c0_16] : memref<1x128xf32, #tpu.memory_space<vmem>>, vector<1x128xf32>
    %20 = vector.broadcast %19 : vector<1x128xf32> to vector<512x128xf32>
    %21 = arith.addf %18, %20 : vector<512x128xf32>
    %cst_17 = arith.constant 0.000000e+00 : f32
    %22 = vector.broadcast %cst_17 : f32 to vector<512x128xf32>
    %23 = arith.maximumf %21, %22 : vector<512x128xf32>
    %24 = arith.truncf %23 : vector<512x128xf32> to vector<512x128xbf16>
    %25 = vector.shape_cast %24 : vector<512x128xbf16> to vector<32x16x128xbf16>
    %cst_18 = arith.constant dense<0xFF80> : vector<32x128xbf16>
    %26 = vector.multi_reduction <maximumf>, %25, %cst_18 [1] : vector<32x16x128xbf16> to vector<32x128xbf16>
    %c0_19 = arith.constant 0 : index
    %c0_20 = arith.constant 0 : index
    %27 = vector.load %arg8[%c0_19, %c0_20] : memref<128x128xbf16, #tpu.memory_space<vmem>>, vector<128x128xbf16>
    %cst_21 = arith.constant dense<0.000000e+00> : vector<32x128xf32>
    %28 = tpu.matmul %26, %27, %cst_21 {dimension_numbers = #tpu.dot_dimension_numbers<[1], [0], [0], [1], [0, 0, 1, 1], [], []>} : vector<32x128xbf16>, vector<128x128xbf16>, vector<32x128xf32> -> vector<32x128xf32>
    %c0_22 = arith.constant 0 : index
    %c0_23 = arith.constant 0 : index
    %29 = vector.load %arg9[%c0_22, %c0_23] : memref<1x128xf32, #tpu.memory_space<vmem>>, vector<1x128xf32>
    %30 = vector.broadcast %29 : vector<1x128xf32> to vector<32x128xf32>
    %31 = arith.addf %28, %30 : vector<32x128xf32>
    %cst_24 = arith.constant 0.000000e+00 : f32
    %32 = vector.broadcast %cst_24 : f32 to vector<32x128xf32>
    %33 = arith.maximumf %31, %32 : vector<32x128xf32>
    %34 = arith.truncf %33 : vector<32x128xf32> to vector<32x128xbf16>
    %c0_25 = arith.constant 0 : index
    %c0_26 = arith.constant 0 : index
    %35 = vector.load %arg10[%c0_25, %c0_26] : memref<128x128xbf16, #tpu.memory_space<vmem>>, vector<128x128xbf16>
    %cst_27 = arith.constant dense<0.000000e+00> : vector<32x128xf32>
    %36 = tpu.matmul %34, %35, %cst_27 {dimension_numbers = #tpu.dot_dimension_numbers<[1], [0], [0], [1], [0, 0, 1, 1], [], []>} : vector<32x128xbf16>, vector<128x128xbf16>, vector<32x128xf32> -> vector<32x128xf32>
    %c0_28 = arith.constant 0 : index
    %c0_29 = arith.constant 0 : index
    %37 = vector.load %arg11[%c0_28, %c0_29] : memref<1x128xf32, #tpu.memory_space<vmem>>, vector<1x128xf32>
    %38 = vector.broadcast %37 : vector<1x128xf32> to vector<32x128xf32>
    %39 = arith.addf %36, %38 : vector<32x128xf32>
    %cst_30 = arith.constant 0.000000e+00 : f32
    %40 = vector.broadcast %cst_30 : f32 to vector<32x128xf32>
    %41 = arith.maximumf %39, %40 : vector<32x128xf32>
    %c0_31 = arith.constant 0 : index
    %c0_32 = arith.constant 0 : index
    %42 = vector.load %arg12[%c0_31, %c0_32] : memref<32x128xf32, #tpu.memory_space<vmem>>, vector<32x128xf32>
    tpu.vector_store %arg12[%c0_31, %c0_32], %41 {strides = array<i32>} : memref<32x128xf32, #tpu.memory_space<vmem>>, vector<32x128xf32>,
    return
  }
  func.func @transform_0(%arg0: i32) -> (i32, i32) {
    %c0_i32 = arith.constant 0 : i32
    %c0_i32_0 = arith.constant 0 : i32
    return %arg0, %c0_i32 : i32, i32
  }
  func.func @transform_1(%arg0: i32) -> (i32, i32) {
    %c0_i32 = arith.constant 0 : i32
    %c0_i32_0 = arith.constant 0 : i32
    %c0_i32_1 = arith.constant 0 : i32
    return %c0_i32, %c0_i32_0 : i32, i32
  }
  func.func @transform_2(%arg0: i32) -> (i32, i32) {
    %c0_i32 = arith.constant 0 : i32
    %c0_i32_0 = arith.constant 0 : i32
    %c0_i32_1 = arith.constant 0 : i32
    return %c0_i32, %c0_i32_0 : i32, i32
  }
  func.func @transform_3(%arg0: i32) -> (i32, i32) {
    %c0_i32 = arith.constant 0 : i32
    %c0_i32_0 = arith.constant 0 : i32
    %c0_i32_1 = arith.constant 0 : i32
    return %c0_i32, %c0_i32_0 : i32, i32
  }
  func.func @transform_4(%arg0: i32) -> (i32, i32) {
    %c0_i32 = arith.constant 0 : i32
    %c0_i32_0 = arith.constant 0 : i32
    %c0_i32_1 = arith.constant 0 : i32
    return %c0_i32, %c0_i32_0 : i32, i32
  }
  func.func @transform_5(%arg0: i32) -> (i32, i32) {
    %c0_i32 = arith.constant 0 : i32
    %c0_i32_0 = arith.constant 0 : i32
    %c0_i32_1 = arith.constant 0 : i32
    return %c0_i32, %c0_i32_0 : i32, i32
  }
  func.func @transform_6(%arg0: i32) -> (i32, i32) {
    %c0_i32 = arith.constant 0 : i32
    %c0_i32_0 = arith.constant 0 : i32
    %c0_i32_1 = arith.constant 0 : i32
    return %c0_i32, %c0_i32_0 : i32, i32
  }
  func.func @transform_7(%arg0: i32) -> (i32, i32) {
    %c0_i32 = arith.constant 0 : i32
    %c0_i32_0 = arith.constant 0 : i32
    %c0_i32_1 = arith.constant 0 : i32
    return %c0_i32, %c0_i32_0 : i32, i32
  }
  func.func @transform_8(%arg0: i32) -> (i32, i32) {
    %c0_i32 = arith.constant 0 : i32
    %c0_i32_0 = arith.constant 0 : i32
    %c0_i32_1 = arith.constant 0 : i32
    return %c0_i32, %c0_i32_0 : i32, i32
  }
  func.func @transform_9(%arg0: i32) -> (i32, i32) {
    %c0_i32 = arith.constant 0 : i32
    %c0_i32_0 = arith.constant 0 : i32
    %c0_i32_1 = arith.constant 0 : i32
    return %c0_i32, %c0_i32_0 : i32, i32
  }
  func.func @transform_10(%arg0: i32) -> (i32, i32) {
    %c0_i32 = arith.constant 0 : i32
    %c0_i32_0 = arith.constant 0 : i32
    %c0_i32_1 = arith.constant 0 : i32
    return %c0_i32, %c0_i32_0 : i32, i32
  }
  func.func @transform_11(%arg0: i32) -> (i32, i32) {
    %c0_i32 = arith.constant 0 : i32
    %c0_i32_0 = arith.constant 0 : i32
    return %arg0, %c0_i32 : i32, i32
  }
}

</mosaic_0001>

<bundles_post_ra>
// kernel: custom-call.8
= control target key start
LH: loop header
LB: loop body
LE: loop exit
PB: predicated region body
PF: predicated region fallthrough
CT: control target
= control target key end

     0   :  { %s6_s0 = inlined_call_operand.vmem [shape: f32[2,64], index: 0, kind: output, shape index: {}]  }

// kernel: proposal_generator_forward.1
= control target key start
LH: loop header
LB: loop body
LE: loop exit
PB: predicated region body
PF: predicated region fallthrough
CT: control target
= control target key end

     0   :  { %16 = vsyncpa [#allocation3], 0  ;;  %s4004_s0 = inlined_call_operand.hbm [shape: bf16[512,35], index: 0, kind: input, shape index: {}]   ;;  %s4005_s1 = inlined_call_operand.hbm [shape: bf16[35,128], index: 1, kind: input, shape index: {}]   ;;  %s4006_s2 = inlined_call_operand.hbm [shape: f32[1,128], index: 2, kind: input, shape index: {}]   ;;  %s4007_s3 = inlined_call_operand.hbm [shape: bf16[128,128], index: 3, kind: input, shape index: {}]   ;;  %s4008_s4 = inlined_call_operand.hbm [shape: f32[1,128], index: 4, kind: input, shape index: {}]   ;;  %s4009_s5 = inlined_call_operand.hbm [shape: bf16[128,128], index: 5, kind: input, shape index: {}]   ;;  %s4010_s6 = inlined_call_operand.hbm [shape: f32[1,128], index: 6, kind: input, shape index: {}]   ;;  %s4011_s7 = inlined_call_operand.hbm [shape: bf16[128,128], index: 7, kind: input, shape index: {}]   ;;  %s4012_s8 = inlined_call_operand.hbm [shape: f32[1,128], index: 8, kind: input, shape index: {}]   ;;  %s4013_s9 = inlined_call_operand.hbm [shape: bf16[128,128], index: 9, kind: input, shape index: {}]   ;;  %s4014_s10 = inlined_call_operand.hbm [shape: f32[1,128], index: 10, kind: input, shape index: {}]   ;;  %s4015_s11 = inlined_call_operand.hbm [shape: f32[32,128], index: 11, kind: output, shape index: {}]  }
   0x1   :  { %17 = vsyncpa [#allocation6], 0 }
   0x2   :  { %18 = vsyncpa [#allocation9], 0 }
   0x3   :  { %19 = vsyncpa [#allocation12], 0 }
   0x4   :  { %20 = vsyncpa [#allocation15], 0 }
   0x5   :  { %21 = vsyncpa [#allocation18], 0 }
   0x6   :  { %22 = vsyncpa [#allocation4], 0  ;;  %s3408_s17 = smov [#allocation5]   ;;  %s3409_s19 = smov [#allocation8]  }
   0x7   :  { %s40_s18 = sshll.u32 %s3408_s17, 4  ;;  %s62_s20 = sshll.u32 %s3409_s19, 4  ;;  %s41_s18 = int_to_ptr.vmem [resolvable:$true] %s40_s18  ;;  %s3485_s20 = int_to_ptr.vmem [resolvable:$true] %s62_s20 }
   0x8   :  { %s3130_s23 = scalar_lea.hbm %s4005_s1, 320 }
   0x9   :  { %p3131_p0 = scmp.ne.s32.totalorder %s4005_s1, %s3130_s23  ;;  %p3134_p1 = scmp.lt.u32.totalorder %s3130_s23, %s4005_s1 }
   0xb   :  { %p3136_p2 = pnand %p3134_p1, %p3131_p0 }
   0xd   :  { %3139 = shalt.err (!%p3136_p2)
}
   0xe   :  { %s3140_s28 = scalar_lea.vmem %s41_s18, 320  ;;  %p3145_p4 = scmp.lt.s32.totalorder %s41_s18, %s41_s18 }
   0xf   :  { %p3141_p3 = scmp.ne.s32.totalorder %s41_s18, %s3140_s28  ;;  %p3146_p5 = scmp.lt.s32.totalorder %s3140_s28, %s3140_s28 }
  0x11   :  { %p3147_p6 = por %p3146_p5, %p3145_p4 }
  0x13   :  { %p3148_p7 = pnand %p3147_p6, %p3141_p3 }
  0x15   :  { %3151 = shalt.err (!%p3148_p7)
}
  0x16   :  { %s3410_s29 = smov 64   ;;  %s3411_s30 = smov 4  }
  0x17   :  { %46 = dma.hbm_to_vmem [thread:$0]  %s4005_s1, 320, %s41_s18, [#allocation6], %s3410_s29, %s3410_s29, %s3411_s30  }
  0x18   :  { %s3152_s16 = scalar_lea.hbm %s4007_s3, 1024 }
  0x19   :  { %p3153_p8 = scmp.ne.s32.totalorder %s4007_s3, %s3152_s16  ;;  %p3156_p9 = scmp.lt.u32.totalorder %s3152_s16, %s4007_s3 }
  0x1b   :  { %p3158_p10 = pnand %p3156_p9, %p3153_p8 }
  0x1d   :  { %3161 = shalt.err (!%p3158_p10)
}
  0x1e   :  { %s3162_s23 = scalar_lea.vmem %s3485_s20, 1024  ;;  %p3167_p12 = scmp.lt.s32.totalorder %s3485_s20, %s3485_s20 }
  0x1f   :  { %p3163_p11 = scmp.ne.s32.totalorder %s3485_s20, %s3162_s23  ;;  %p3168_p13 = scmp.lt.s32.totalorder %s3162_s23, %s3162_s23 }
  0x21   :  { %p3169_p0 = por %p3168_p13, %p3167_p12 }
  0x23   :  { %p3170_p1 = pnand %p3169_p0, %p3163_p11 }
  0x25   :  { %3173 = shalt.err (!%p3170_p1)
}
  0x26   :  { %68 = dma.hbm_to_vmem [thread:$0]  %s4007_s3, 1024, %s3485_s20, [#allocation9], %s3410_s29, %s3410_s29, %s3411_s30  }
  0x27   :  { %s3412_s24 = smov [#allocation11]   ;;  %s3413_s26 = smov [#allocation14]  }
  0x28   :  { %s84_s25 = sshll.u32 %s3412_s24, 4  ;;  %s106_s27 = sshll.u32 %s3413_s26, 4  ;;  %s85_s25 = int_to_ptr.vmem [resolvable:$true] %s84_s25  ;;  %s3522_s27 = int_to_ptr.vmem [resolvable:$true] %s106_s27 }
  0x29   :  { %s3174_s13 = scalar_lea.hbm %s4009_s5, 1024 }
  0x2a   :  { %p3175_p2 = scmp.ne.s32.totalorder %s4009_s5, %s3174_s13  ;;  %p3178_p3 = scmp.lt.u32.totalorder %s3174_s13, %s4009_s5 }
  0x2c   :  { %p3180_p4 = pnand %p3178_p3, %p3175_p2 }
  0x2e   :  { %3183 = shalt.err (!%p3180_p4)
}
  0x2f   :  { %s3184_s3 = scalar_lea.vmem %s85_s25, 1024  ;;  %p3189_p6 = scmp.lt.s32.totalorder %s85_s25, %s85_s25 }
  0x30   :  { %p3185_p5 = scmp.ne.s32.totalorder %s85_s25, %s3184_s3  ;;  %p3190_p7 = scmp.lt.s32.totalorder %s3184_s3, %s3184_s3 }
  0x32   :  { %p3191_p8 = por %p3190_p7, %p3189_p6 }
  0x34   :  { %p3192_p9 = pnand %p3191_p8, %p3185_p5 }
  0x36   :  { %3195 = shalt.err (!%p3192_p9)
}
  0x37   :  { %90 = dma.hbm_to_vmem [thread:$0]  %s4009_s5, 1024, %s85_s25, [#allocation12], %s3410_s29, %s3410_s29, %s3411_s30  }
  0x38   :  { %s3196_s23 = scalar_lea.hbm %s4011_s7, 1024 }
  0x39   :  { %p3197_p10 = scmp.ne.s32.totalorder %s4011_s7, %s3196_s23  ;;  %p3200_p11 = scmp.lt.u32.totalorder %s3196_s23, %s4011_s7 }
  0x3b   :  { %p3202_p12 = pnand %p3200_p11, %p3197_p10 }
  0x3d   :  { %3205 = shalt.err (!%p3202_p12)
}
  0x3e   :  { %s3206_s28 = scalar_lea.vmem %s3522_s27, 1024  ;;  %p3211_p0 = scmp.lt.s32.totalorder %s3522_s27, %s3522_s27 }
  0x3f   :  { %p3207_p13 = scmp.ne.s32.totalorder %s3522_s27, %s3206_s28  ;;  %p3212_p1 = scmp.lt.s32.totalorder %s3206_s28, %s3206_s28 }
  0x41   :  { %p3213_p2 = por %p3212_p1, %p3211_p0 }
  0x43   :  { %p3214_p3 = pnand %p3213_p2, %p3207_p13 }
  0x45   :  { %3217 = shalt.err (!%p3214_p3)
}
  0x46   :  { %112 = dma.hbm_to_vmem [thread:$0]  %s4011_s7, 1024, %s3522_s27, [#allocation15], %s3410_s29, %s3410_s29, %s3411_s30  }
  0x47   :  { %s3414_s12 = smov [#allocation17]   ;;  %s3415_s14 = smov [#allocation2]  }
  0x48   :  { %s128_s13 = sshll.u32 %s3414_s12, 4  ;;  %s28_s15 = sshll.u32 %s3415_s14, 4  ;;  %s129_s13 = int_to_ptr.vmem [resolvable:$true] %s128_s13  ;;  %s3559_s15 = int_to_ptr.vmem [resolvable:$true] %s28_s15 }
  0x49   :  { %s3218_s3 = scalar_lea.hbm %s4013_s9, 1024 }
  0x4a   :  { %p3219_p4 = scmp.ne.s32.totalorder %s4013_s9, %s3218_s3  ;;  %p3222_p5 = scmp.lt.u32.totalorder %s3218_s3, %s4013_s9 }
  0x4c   :  { %p3224_p6 = pnand %p3222_p5, %p3219_p4 }
  0x4e   :  { %3227 = shalt.err (!%p3224_p6)
}
  0x4f   :  { %s3228_s7 = scalar_lea.vmem %s129_s13, 1024  ;;  %p3233_p8 = scmp.lt.s32.totalorder %s129_s13, %s129_s13 }
  0x50   :  { %p3229_p7 = scmp.ne.s32.totalorder %s129_s13, %s3228_s7  ;;  %p3234_p9 = scmp.lt.s32.totalorder %s3228_s7, %s3228_s7 }
  0x52   :  { %p3235_p10 = por %p3234_p9, %p3233_p8 }
  0x54   :  { %p3236_p11 = pnand %p3235_p10, %p3229_p7 }
  0x56   :  { %3239 = shalt.err (!%p3236_p11)
}
  0x57   :  { %134 = dma.hbm_to_vmem [thread:$0]  %s4013_s9, 1024, %s129_s13, [#allocation18], %s3410_s29, %s3410_s29, %s3411_s30  }
  0x58   :  { %s3240_s24 = scalar_lea.hbm %s4004_s0, 4096 }
  0x59   :  { %p3241_p12 = scmp.ne.s32.totalorder %s4004_s0, %s3240_s24  ;;  %p3244_p13 = scmp.lt.u32.totalorder %s3240_s24, %s4004_s0 }
  0x5b   :  { %p3246_p0 = pnand %p3244_p13, %p3241_p12 }
  0x5d   :  { %3249 = shalt.err (!%p3246_p0)
}
  0x5e   :  { %s3250_s12 = scalar_lea.vmem %s3559_s15, 4096  ;;  %p3255_p2 = scmp.lt.s32.totalorder %s3559_s15, %s3559_s15 }
  0x5f   :  { %p3251_p1 = scmp.ne.s32.totalorder %s3559_s15, %s3250_s12  ;;  %p3256_p3 = scmp.lt.s32.totalorder %s3250_s12, %s3250_s12 }
  0x61   :  { %p3257_p4 = por %p3256_p3, %p3255_p2 }
  0x63   :  { %p3258_p5 = pnand %p3257_p4, %p3251_p1 }
  0x65   :  { %3261 = shalt.err (!%p3258_p5)
}
  0x66   :  { %34 = dma.hbm_to_vmem [thread:$0]  %s4004_s0, 4096, %s3559_s15, [#allocation3], %s3410_s29, %s3410_s29, %s3411_s30  }
  0x67   :  { %s3416_s14 = smov [#allocation7]   ;;  %s3417_s17 = smov [#allocation10]  }
  0x68   :  { %s53_s16 = sshll.u32 %s3416_s14, 4  ;;  %s75_s3 = sshll.u32 %s3417_s17, 4  ;;  %s54_s16 = int_to_ptr.vmem [resolvable:$true] %s53_s16  ;;  %s76_s3 = int_to_ptr.vmem [resolvable:$true] %s75_s3 }
  0x69   :  { %s3262_s21 = scalar_lea.hbm %s4006_s2, 16 }
  0x6a   :  { %p3263_p6 = scmp.ne.s32.totalorder %s4006_s2, %s3262_s21  ;;  %p3266_p7 = scmp.lt.u32.totalorder %s3262_s21, %s4006_s2 }
  0x6c   :  { %p3268_p8 = pnand %p3266_p7, %p3263_p6 }
  0x6e   :  { %3271 = shalt.err (!%p3268_p8)
}
  0x6f   :  { %s3272_s0 = scalar_lea.vmem %s54_s16, 16  ;;  %s3276_s29 = scalar_lea.vmem %s54_s16, 32 }
  0x70   :  { %p3273_p9 = scmp.ne.s32.totalorder %s54_s16, %s3272_s0  ;;  %p3277_p10 = scmp.lt.s32.totalorder %s54_s16, %s54_s16 }
  0x71   :  { %p3278_p11 = scmp.lt.s32.totalorder %s3276_s29, %s3272_s0 }
  0x73   :  { %p3279_p12 = por %p3278_p11, %p3277_p10 }
  0x75   :  { %p3280_p13 = pnand %p3279_p12, %p3273_p9 }
  0x77   :  { %3283 = shalt.err (!%p3280_p13)
}
  0x78   :  { %56 = dma.hbm_to_vmem [thread:$0]  %s4006_s2, 16, %s54_s16, [#allocation6]  }
  0x79   :  { %s3284_s24 = scalar_lea.hbm %s4008_s4, 16 }
  0x7a   :  { %p3285_p0 = scmp.ne.s32.totalorder %s4008_s4, %s3284_s24  ;;  %p3288_p1 = scmp.lt.u32.totalorder %s3284_s24, %s4008_s4 }
  0x7c   :  { %p3290_p2 = pnand %p3288_p1, %p3285_p0 }
  0x7e   :  { %3293 = shalt.err (!%p3290_p2)
}
  0x7f   :  { %s3294_s12 = scalar_lea.vmem %s76_s3, 16  ;;  %s3298_s9 = scalar_lea.vmem %s76_s3, 32 }
  0x80   :  { %p3295_p3 = scmp.ne.s32.totalorder %s76_s3, %s3294_s12  ;;  %p3299_p4 = scmp.lt.s32.totalorder %s76_s3, %s76_s3 }
  0x81   :  { %p3300_p5 = scmp.lt.s32.totalorder %s3298_s9, %s3294_s12 }
  0x83   :  { %p3301_p6 = por %p3300_p5, %p3299_p4 }
  0x85   :  { %p3302_p7 = pnand %p3301_p6, %p3295_p3 }
  0x87   :  { %3305 = shalt.err (!%p3302_p7)
}
  0x88   :  { %78 = dma.hbm_to_vmem [thread:$0]  %s4008_s4, 16, %s76_s3, [#allocation9]  }
  0x89   :  { %s3418_s14 = smov [#allocation13]   ;;  %s3419_s17 = smov [#allocation16]  }
  0x8a   :  { %s97_s16 = sshll.u32 %s3418_s14, 4  ;;  %s119_s20 = sshll.u32 %s3419_s17, 4  ;;  %s98_s16 = int_to_ptr.vmem [resolvable:$true] %s97_s16  ;;  %s120_s20 = int_to_ptr.vmem [resolvable:$true] %s119_s20 }
  0x8b   :  { %s3306_s22 = scalar_lea.hbm %s4010_s6, 16 }
  0x8c   :  { %p3307_p8 = scmp.ne.s32.totalorder %s4010_s6, %s3306_s22  ;;  %p3310_p9 = scmp.lt.u32.totalorder %s3306_s22, %s4010_s6 }
  0x8e   :  { %p3312_p10 = pnand %p3310_p9, %p3307_p8 }
  0x90   :  { %3315 = shalt.err (!%p3312_p10)
}
  0x91   :  { %s3316_s4 = scalar_lea.vmem %s98_s16, 16  ;;  %s3320_s3 = scalar_lea.vmem %s98_s16, 32 }
  0x92   :  { %p3317_p11 = scmp.ne.s32.totalorder %s98_s16, %s3316_s4  ;;  %p3321_p12 = scmp.lt.s32.totalorder %s98_s16, %s98_s16 }
  0x93   :  { %p3322_p13 = scmp.lt.s32.totalorder %s3320_s3, %s3316_s4 }
  0x95   :  { %p3323_p0 = por %p3322_p13, %p3321_p12 }
  0x97   :  { %p3324_p1 = pnand %p3323_p0, %p3317_p11 }
  0x99   :  { %3327 = shalt.err (!%p3324_p1)
}
  0x9a   :  { %100 = dma.hbm_to_vmem [thread:$0]  %s4010_s6, 16, %s98_s16, [#allocation12]  }
  0x9b   :  { %s3328_s18 = scalar_lea.hbm %s4012_s8, 16 }
  0x9c   :  { %p3329_p2 = scmp.ne.s32.totalorder %s4012_s8, %s3328_s18  ;;  %p3332_p3 = scmp.lt.u32.totalorder %s3328_s18, %s4012_s8 }
  0x9e   :  { %p3334_p4 = pnand %p3332_p3, %p3329_p2 }
  0xa0   :  { %3337 = shalt.err (!%p3334_p4)
}
  0xa1   :  { %s3338_s25 = scalar_lea.vmem %s120_s20, 16  ;;  %s3342_s12 = scalar_lea.vmem %s120_s20, 32 }
  0xa2   :  { %p3339_p5 = scmp.ne.s32.totalorder %s120_s20, %s3338_s25  ;;  %p3343_p6 = scmp.lt.s32.totalorder %s120_s20, %s120_s20 }
  0xa3   :  { %p3344_p7 = scmp.lt.s32.totalorder %s3342_s12, %s3338_s25 }
  0xa5   :  { %p3345_p8 = por %p3344_p7, %p3343_p6 }
  0xa7   :  { %p3346_p9 = pnand %p3345_p8, %p3339_p5 }
  0xa9   :  { %3349 = shalt.err (!%p3346_p9)
}
  0xaa   :  { %122 = dma.hbm_to_vmem [thread:$0]  %s4012_s8, 16, %s120_s20, [#allocation15]  }
  0xab   :  { %s3420_s2 = smov [#allocation19]   ;;  %s3350_s17 = scalar_lea.hbm %s4014_s10, 16 }
  0xac   :  { %s141_s13 = sshll.u32 %s3420_s2, 4  ;;  %p3351_p10 = scmp.ne.s32.totalorder %s4014_s10, %s3350_s17  ;;  %s142_s13 = int_to_ptr.vmem [resolvable:$true] %s141_s13 }
  0xad   :  { %p3354_p11 = scmp.lt.u32.totalorder %s3350_s17, %s4014_s10 }
  0xaf   :  { %p3356_p12 = pnand %p3354_p11, %p3351_p10 }
  0xb1   :  { %3359 = shalt.err (!%p3356_p12)
}
  0xb2   :  { %s3360_s27 = scalar_lea.vmem %s142_s13, 16  ;;  %s3364_s8 = scalar_lea.vmem %s142_s13, 32 }
  0xb3   :  { %p3361_p13 = scmp.ne.s32.totalorder %s142_s13, %s3360_s27  ;;  %p3365_p0 = scmp.lt.s32.totalorder %s142_s13, %s142_s13 }
  0xb4   :  { %p3366_p1 = scmp.lt.s32.totalorder %s3364_s8, %s3360_s27 }
  0xb6   :  { %p3367_p2 = por %p3366_p1, %p3365_p0 }
  0xb8   :  { %p3368_p3 = pnand %p3367_p2, %p3361_p13 }
  0xba   :  { %3371 = shalt.err (!%p3368_p3)
}
  0xbb   :  { %144 = dma.hbm_to_vmem [thread:$0]  %s4014_s10, 16, %s142_s13, [#allocation18]  }
  0xbc   :  { %3394 = dma.done.wait [#allocation3], 4096  }
  0xbd   :  { %3395 = vsyncadd [#allocation3], 4294963200 }
  0xbe   :  { %3396 = dma.done.wait [#allocation6], 336  }
  0xbf   :  { %3397 = vsyncadd [#allocation6], 4294966960 }
  0xc0   :  { %3398 = dma.done.wait [#allocation9], 1040  }
  0xc1   :  { %3399 = vsyncadd [#allocation9], 4294966256 }
  0xc2   :  { %3400 = dma.done.wait [#allocation12], 1040  }
  0xc3   :  { %3401 = vsyncadd [#allocation12], 4294966256 }
  0xc4   :  { %3402 = dma.done.wait [#allocation15], 1040  }
  0xc5   :  { %3403 = vsyncadd [#allocation15], 4294966256 }
  0xc6   :  { %3404 = dma.done.wait [#allocation18], 1040  }
  0xc7   :  { %3405 = vsyncadd [#allocation18], 4294966256  ;;  %vm527_vm0 = vcmask 1040384   ;;  %vm528_vm1 = vcmask 1041408   ;;  %v3421_v0 = vmov 65535   ;;  %v3062_v2 = vld [vmem:[#allocation5] sm:$0xff]  }
  0xc8   :  { %v529_v1 = vsel %vm527_vm0, 4294967295, %v3421_v0  ;;  %vm430_vm2 = vcmask 285696   ;;  %v3063_v3 = vld [vmem:[#allocation5 + $0x8] sm:$0xff]   ;;  %2769 = vmatprep.subr.bf16.mxu0 %v3062_v2  ;;  %v3064_v5 = vld [vmem:[#allocation5 + $0x10] ss:$0 sps:$4 sm:$0x33]   ;;  %3039 = vmatprep.subr.bf16.mxu1 %v3062_v2 }
  0xc9   :  { %v530_v4 = vsel %vm528_vm1, %v529_v1, 0  ;;  %v3065_v6 = vld [vmem:[#allocation2] sm:$0xff]   ;;  %2770 = vmatpush3.bf16.msra.mxu0 %v3062_v2  ;;  %3042 = vmatpush3.bf16.msra.mxu1 %v3062_v2  ;;  %v3066_v8 = vld [vmem:[#allocation2 + $0x8] sm:$0xff]   ;;  %v3067_v9 = vld [vmem:[#allocation2 + $0x10] sm:$0xff]   ;;  %vm2238_vm3 = vcmask 1041409   ;;  %vm2240_vm4 = vcmask 1042434  }
  0xca   :  { %2771 = vmatprep.subr.bf16.mxu0 %v3063_v3  ;;  %v532_v7 = vand.u32 %v3064_v5, %v530_v4  ;;  %2775 = vmatprep.mubr.msk.bf16.mxu0 %vm430_vm2, %v3065_v6  ;;  %v3068_v10 = vld [vmem:[#allocation2 + $0x18] sm:$0xff]   ;;  %v3069_v11 = vld [vmem:[#allocation2 + $0x20] sm:$0xff]   ;;  %v3070_v12 = vld [vmem:[#allocation2 + $0x28] sm:$0xff]   ;;  %vm2242_vm5 = vcmask 1043459   ;;  %vm2244_vm6 = vcmask 1044484   ;;  %vm2246_vm7 = vcmask 1045509  }
  0xcb   :  { %3040 = vmatprep.subr.bf16.mxu1 %v3063_v3  ;;  %v3071_v13 = vld [vmem:[#allocation2 + $0x30] sm:$0xff]   ;;  %v3088_v15 = vld [vmem:[#allocation2 + $0xb8] sm:$0xff]   ;;  %v3089_v16 = vld [vmem:[#allocation2 + $0xc0] sm:$0xff]   ;;  %vm2248_vm8 = vcmask 1046534   ;;  %vm2250_vm9 = vcmask 1047559   ;;  %s3422_s10 = smov [#allocation20]  }
  0xcc   :  { %v3087_v14 = vld [vmem:[#allocation2 + $0xb0] sm:$0xff]   ;;  %v3072_v17 = vld [vmem:[#allocation2 + $0x38] sm:$0xff]   ;;  %v3090_v18 = vld [vmem:[#allocation2 + $0xc8] sm:$0xff]   ;;  %s2513_s0 = sshll.u32 %s3422_s10, 4  ;;  %s2514_s0 = int_to_ptr.vmem [resolvable:$true] %s2513_s0 }
  0xcd   :  { %2772 = vmatpush3.bf16.msra.mxu0 %v3063_v3  ;;  %3043 = vmatpush3.bf16.msra.mxu1 %v3063_v3  ;;  %v3091_v19 = vld [vmem:[#allocation2 + $0xd0] sm:$0xff]   ;;  %v3073_v20 = vld [vmem:[#allocation2 + $0x40] sm:$0xff]   ;;  %v3092_v23 = vld [vmem:[#allocation2 + $0xd8] sm:$0xff]   ;;  %s3372_s4 = scalar_lea.vmem %s2514_s0, 512  ;;  %p3377_p5 = scmp.lt.s32.totalorder %s2514_s0, %s2514_s0 }
  0xce   :  { %2773 = vmatprep.subr.bf16.mxu0 %v532_v7  ;;  %3041 = vmatprep.subr.bf16.mxu1 %v532_v7  ;;  %v3097_v21 = vld [vmem:[#allocation8] sm:$0xff]   ;;  %v3098_v22 = vld [vmem:[#allocation8 + $0x8] sm:$0xff]   ;;  %v3099_v24 = vld [vmem:[#allocation8 + $0x10] sm:$0xff]   ;;  %p3373_p4 = scmp.ne.s32.totalorder %s2514_s0, %s3372_s4  ;;  %p3378_p6 = scmp.lt.s32.totalorder %s3372_s4, %s3372_s4 }
  0xcf   :  { %2819 = vmatprep.mubr.msk.bf16.mxu1 %vm430_vm2, %v3087_v14  ;;  %v3074_v25 = vld [vmem:[#allocation2 + $0x48] sm:$0xff]   ;;  %v3093_v26 = vld [vmem:[#allocation2 + $0xe0] sm:$0xff]   ;;  %v3075_v27 = vld [vmem:[#allocation2 + $0x50] sm:$0xff]  }
  0xd0   :  { %v3100_v28 = vld [vmem:[#allocation8 + $0x18] sm:$0xff]   ;;  %v3101_v29 = vld [vmem:[#allocation8 + $0x20] sm:$0xff]   ;;  %v3077_v33 = vld [vmem:[#allocation2 + $0x60] sm:$0xff]   ;;  %p3379_p7 = por %p3378_p6, %p3377_p5 }
  0xd1   :  { %2774 = vmatpush3.bf16.msra.mxu0 %v532_v7  ;;  %3044 = vmatpush3.bf16.msra.mxu1 %v532_v7  ;;  %v3094_v30 = vld [vmem:[#allocation2 + $0xe8] sm:$0xff]   ;;  %v3095_v31 = vld [vmem:[#allocation2 + $0xf0] sm:$0xff]   ;;  %v3076_v32 = vld [vmem:[#allocation2 + $0x58] sm:$0xff]  }
  0xd2   :  { %2839 = vmatprep.subr.bf16.mxu1 %v3097_v21  ;;  %v3102_v34 = vld [vmem:[#allocation8 + $0x28] sm:$0xff]   ;;  %v3078_v36 = vld [vmem:[#allocation2 + $0x68] sm:$0xff]   ;;  %v3079_v37 = vld [vmem:[#allocation2 + $0x70] sm:$0xff]   ;;  %p3380_p8 = pnand %p3379_p7, %p3373_p4 }
  0xd3   :  { %v3096_v35 = vld [vmem:[#allocation2 + $0xf8] sm:$0xff]   ;;  %v3081_v39 = vld [vmem:[#allocation2 + $0x80] sm:$0xff]   ;;  %v3082_v40 = vld [vmem:[#allocation2 + $0x88] sm:$0xff]  }
  0xd4   :  { %2776 = vmatmul.mubr.msk.bf16.vlgmr.msra.gmra.mrb[0].mxu0 %vm430_vm2, %v3066_v8  ;;  %2820 = vmatmul.mubr.msk.bf16.vlgmr.msra.gmra.mrb[0].mxu1 %vm430_vm2, %v3088_v15  ;;  %v3080_v38 = vld [vmem:[#allocation2 + $0x78] sm:$0xff]   ;;  %v3083_v41 = vld [vmem:[#allocation2 + $0x90] sm:$0xff]   ;;  %v3085_v43 = vld [vmem:[#allocation2 + $0xa0] sm:$0xff]  }
  0xd5   :  { %2779 = vmatprep.mubr.msk.bf16.mxu0 %vm430_vm2, %v3067_v9  ;;  %2823 = vmatprep.mubr.msk.bf16.mxu1 %vm430_vm2, %v3089_v16  ;;  %v3084_v42 = vld [vmem:[#allocation2 + $0x98] sm:$0xff]   ;;  %v3086_v44 = vld [vmem:[#allocation2 + $0xa8] sm:$0xff]   ;;  %v3688_v47 = vld [vmem:[#allocation7] ss:$0 sm:$0xff] }
  0xd6   :  { %2840 = vmatpush3.bf16.msra.mxu1 %v3097_v21  ;;  %v3103_v45 = vld [vmem:[#allocation8 + $0x30] sm:$0xff]   ;;  %v3104_v46 = vld [vmem:[#allocation8 + $0x38] sm:$0xff]   ;;  %v3105_v55 = vld [vmem:[#allocation11] sm:$0xff]  }
  0xd7   :  { %2841 = vmatprep.subr.bf16.mxu1 %v3098_v22  ;;  %v3106_v56 = vld [vmem:[#allocation11 + $0x8] sm:$0xff]   ;;  %2919 = vmatprep.subr.bf16.mxu0 %v3105_v55  ;;  %v3107_v63 = vld [vmem:[#allocation11 + $0x10] sm:$0xff]   ;;  %v3108_v8 = vld [vmem:[#allocation11 + $0x18] sm:$0xff]  }
  0xd8   :  { %2920 = vmatpush3.bf16.msra.mxu0 %v3105_v55 }
  0xd9   :  { %2921 = vmatprep.subr.bf16.mxu0 %v3106_v56 }
  0xda   :  { %2842 = vmatpush3.bf16.msra.mxu1 %v3098_v22 }
  0xdb   :  { %2843 = vmatprep.subr.bf16.mxu1 %v3099_v24 }
  0xdc   :  { %2780 = vmatmul.mubr.msk.bf16.gmra.mrb[4].mxu0 %vm430_vm2, %v3068_v10  ;;  %2824 = vmatmul.mubr.msk.bf16.gmra.mrb[4].mxu1 %vm430_vm2, %v3090_v18  ;;  %v3109_v18 = vld [vmem:[#allocation11 + $0x20] sm:$0xff]  }
  0xdd   :  { %2783 = vmatprep.mubr.msk.bf16.mxu0 %vm430_vm2, %v3069_v11  ;;  %2827 = vmatprep.mubr.msk.bf16.mxu1 %vm430_vm2, %v3091_v19 }
  0xde   :  { %2844 = vmatpush3.bf16.msra.mxu1 %v3099_v24  ;;  %2922 = vmatpush3.bf16.msra.mxu0 %v3106_v56 }
  0xdf   :  { %2845 = vmatprep.subr.bf16.mxu1 %v3100_v28  ;;  %2923 = vmatprep.subr.bf16.mxu0 %v3107_v63 }
  0xe2   :  { %2846 = vmatpush3.bf16.msra.mxu1 %v3100_v28  ;;  %2924 = vmatpush3.bf16.msra.mxu0 %v3107_v63 }
  0xe3   :  { %2847 = vmatprep.subr.bf16.mxu1 %v3101_v29  ;;  %2925 = vmatprep.subr.bf16.mxu0 %v3108_v8 }
  0xe4   :  { %2784 = vmatmul.mubr.msk.bf16.gmra.mrb[8].mxu0 %vm430_vm2, %v3070_v12  ;;  %2828 = vmatmul.mubr.msk.bf16.gmra.mrb[8].mxu1 %vm430_vm2, %v3092_v23 }
  0xe5   :  { %2787 = vmatprep.mubr.msk.bf16.mxu0 %vm430_vm2, %v3071_v13  ;;  %2831 = vmatprep.mubr.msk.bf16.mxu1 %vm430_vm2, %v3093_v26 }
  0xe6   :  { %2848 = vmatpush3.bf16.msra.mxu1 %v3101_v29  ;;  %2926 = vmatpush3.bf16.msra.mxu0 %v3108_v8 }
  0xe7   :  { %2849 = vmatprep.subr.bf16.mxu1 %v3102_v34  ;;  %2927 = vmatprep.subr.bf16.mxu0 %v3109_v18 }
  0xea   :  { %2850 = vmatpush3.bf16.msra.mxu1 %v3102_v34  ;;  %2928 = vmatpush3.bf16.msra.mxu0 %v3109_v18 }
  0xeb   :  { %2851 = vmatprep.subr.bf16.mxu1 %v3103_v45 }
  0xec   :  { %2788 = vmatmul.mubr.msk.bf16.gmra.mrb[12].mxu0 %vm430_vm2, %v3072_v17  ;;  %2832 = vmatmul.mubr.msk.bf16.gmra.mrb[12].mxu1 %vm430_vm2, %v3094_v30 }
  0xed   :  { %2791 = vmatprep.mubr.msk.bf16.mxu0 %vm430_vm2, %v3073_v20  ;;  %2835 = vmatprep.mubr.msk.bf16.mxu1 %vm430_vm2, %v3095_v31 }
  0xee   :  { %2852 = vmatpush3.bf16.msra.mxu1 %v3103_v45 }
  0xef   :  { %2853 = vmatprep.subr.bf16.mxu1 %v3104_v46 }
  0xf2   :  { %2854 = vmatpush3.bf16.msra.mxu1 %v3104_v46 }
  0xf4   :  { %2792 = vmatmul.mubr.msk.bf16.gmra.mrb[16].mxu0 %vm430_vm2, %v3074_v25  ;;  %2836 = vmatmul.mubr.msk.bf16.gmra.mrb[16].mxu1 %vm430_vm2, %v3096_v35  ;;  %v3110_v35 = vld [vmem:[#allocation11 + $0x28] sm:$0xff]  }
  0xf5   :  { %2795 = vmatprep.mubr.msk.bf16.mxu0 %vm430_vm2, %v3075_v27  ;;  %2929 = vmatprep.subr.bf16.mxu0 %v3110_v35 }
  0xf6   :  { %2930 = vmatpush3.bf16.msra.mxu0 %v3110_v35 }
  0xfc   :  { %2796 = vmatmul.mubr.msk.bf16.gmra.mrb[20].mxu0 %vm430_vm2, %v3076_v32 }
  0xfd   :  { %2799 = vmatprep.mubr.msk.bf16.mxu0 %vm430_vm2, %v3077_v33 }
 0x104   :  { %2800 = vmatmul.mubr.msk.bf16.gmra.mrb[24].mxu0 %vm430_vm2, %v3078_v36 }
 0x105   :  { %2803 = vmatprep.mubr.msk.bf16.mxu0 %vm430_vm2, %v3079_v37 }
 0x10c   :  { %2804 = vmatmul.mubr.msk.bf16.gmra.mrb[28].mxu0 %vm430_vm2, %v3080_v38 }
 0x10d   :  { %2807 = vmatprep.mubr.msk.bf16.mxu0 %vm430_vm2, %v3081_v39 }
 0x114   :  { %2808 = vmatmul.mubr.msk.bf16.gmra.mrb[32].mxu0 %vm430_vm2, %v3082_v40 }
 0x115   :  { %2811 = vmatprep.mubr.msk.bf16.mxu0 %vm430_vm2, %v3083_v41 }
 0x11c   :  { %2812 = vmatmul.mubr.msk.bf16.gmra.mrb[36].mxu0 %vm430_vm2, %v3084_v42 }
 0x11d   :  { %2815 = vmatprep.mubr.msk.bf16.mxu0 %vm430_vm2, %v3085_v43 }
 0x124   :  { %2816 = vmatmul.mubr.msk.bf16.gmra.mrb[40].mxu0 %vm430_vm2, %v3086_v44 }
 0x1a7   :  { %v2777_v48 = vpop.f32.mrb[0].mxu0  ;;  %v2821_v14 = vpop.f32.mrb[0].mxu1 }
 0x1a8   :  { %v577_v49 = vadd.f32 %v2777_v48, %v3688_v47  ;;  %v568_v50 = vpop.f32.mrb[1].mxu0  ;;  %v753_v16 = vadd.f32 %v2821_v14, %v3688_v47  ;;  %v744_v17 = vpop.f32.mrb[1].mxu1 }
 0x1a9   :  { %v569_v51 = vadd.f32 %v3688_v47, %v568_v50  ;;  %v2778_v52 = vpop.f32.mrb[2].mxu0  ;;  %v745_v21 = vadd.f32 %v3688_v47, %v744_v17  ;;  %v2822_v22 = vpop.f32.mrb[2].mxu1 }
 0x1aa   :  { %v580_v53 = vadd.f32 %v2778_v52, %v3688_v47  ;;  %v571_v54 = vpop.f32.mrb[3].mxu0  ;;  %v825_v58 = vmax.f32 %v577_v49, 0.0  ;;  %v869_v25 = vmax.f32 %v753_v16, 0.0  ;;  %v756_v26 = vadd.f32 %v2822_v22, %v3688_v47  ;;  %v747_v27 = vpop.f32.mrb[3].mxu1  ;;  %v3111_v49 = vld [vmem:[#allocation11 + $0x30] sm:$0xff]  }
 0x1ab   :  { %v572_v57 = vadd.f32 %v3688_v47, %v571_v54  ;;  %v823_v60 = vmax.f32 %v569_v51, 0.0  ;;  %v867_v30 = vmax.f32 %v745_v21, 0.0  ;;  %v748_v31 = vadd.f32 %v3688_v47, %v747_v27  ;;  %2931 = vmatprep.subr.bf16.mxu0 %v3111_v49 }
 0x1ac   :  { %v826_v59 = vmax.f32 %v580_v53, 0.0  ;;  %v870_v34 = vmax.f32 %v756_v26, 0.0  ;;  %2932 = vmatpush3.bf16.msra.mxu0 %v3111_v49 }
 0x1ad   :  { %v824_v61 = vmax.f32 %v572_v57, 0.0  ;;  %v868_v37 = vmax.f32 %v748_v31, 0.0 }
 0x1ae   :  { %v888_v62 = vpack.c.bf16 %v826_v59, %v825_v58  ;;  %v3706_v40 = vpack.c.bf16 %v870_v34, %v869_v25 }
 0x1af   :  { %v887_v0 = vpack.c.bf16 %v824_v61, %v823_v60  ;;  %v2781_v1 = vpop.f32.mrb[4].mxu0  ;;  %v3708_v43 = vpack.c.bf16 %v868_v37, %v867_v30  ;;  %v2825_v44 = vpop.f32.mrb[4].mxu1 }
 0x1b0   :  { %v593_v2 = vadd.f32 %v2781_v1, %v3688_v47  ;;  %v584_v3 = vpop.f32.mrb[5].mxu0  ;;  %v769_v46 = vadd.f32 %v2825_v44, %v3688_v47  ;;  %v760_v48 = vpop.f32.mrb[5].mxu1 }
 0x1b1   :  { %v585_v4 = vadd.f32 %v3688_v47, %v584_v3  ;;  %v2782_v5 = vpop.f32.mrb[6].mxu0  ;;  %2855 = vmatprep.mubr.bf16.mxu1 %v887_v0  ;;  %v761_v52 = vadd.f32 %v3688_v47, %v760_v48  ;;  %v2826_v53 = vpop.f32.mrb[6].mxu1 }
 0x1b2   :  { %v596_v6 = vadd.f32 %v2782_v5, %v3688_v47  ;;  %v587_v7 = vpop.f32.mrb[7].mxu0  ;;  %2856 = vmatmul.mubr.bf16.vlgmr.msra.gmra.mrb[20].mxu1 %v888_v62  ;;  %v829_v10 = vmax.f32 %v593_v2, 0.0  ;;  %v873_v56 = vmax.f32 %v769_v46, 0.0  ;;  %v772_v57 = vadd.f32 %v2826_v53, %v3688_v47  ;;  %v763_v58 = vpop.f32.mrb[7].mxu1  ;;  %v3112_v2 = vld [vmem:[#allocation11 + $0x38] sm:$0xff]  }
 0x1b3   :  { %v588_v9 = vadd.f32 %v3688_v47, %v587_v7  ;;  %v827_v12 = vmax.f32 %v585_v4, 0.0  ;;  %v871_v61 = vmax.f32 %v761_v52, 0.0  ;;  %v764_v62 = vadd.f32 %v3688_v47, %v763_v58  ;;  %2933 = vmatprep.subr.bf16.mxu0 %v3112_v2 }
 0x1b4   :  { %v830_v11 = vmax.f32 %v596_v6, 0.0  ;;  %v874_v1 = vmax.f32 %v772_v57, 0.0  ;;  %2934 = vmatpush3.bf16.msra.mxu0 %v3112_v2 }
 0x1b5   :  { %v828_v13 = vmax.f32 %v588_v9, 0.0  ;;  %v872_v4 = vmax.f32 %v764_v62, 0.0 }
 0x1b6   :  { %v890_v15 = vpack.c.bf16 %v830_v11, %v829_v10  ;;  %v3718_v7 = vpack.c.bf16 %v874_v1, %v873_v56 }
 0x1b7   :  { %v889_v19 = vpack.c.bf16 %v828_v13, %v827_v12  ;;  %v2785_v20 = vpop.f32.mrb[8].mxu0  ;;  %v3720_v10 = vpack.c.bf16 %v872_v4, %v871_v61  ;;  %v2829_v11 = vpop.f32.mrb[8].mxu1 }
 0x1b8   :  { %v609_v23 = vadd.f32 %v2785_v20, %v3688_v47  ;;  %v600_v24 = vpop.f32.mrb[9].mxu0  ;;  %v785_v13 = vadd.f32 %v2829_v11, %v3688_v47  ;;  %v776_v14 = vpop.f32.mrb[9].mxu1 }
 0x1b9   :  { %v601_v28 = vadd.f32 %v3688_v47, %v600_v24  ;;  %v2786_v29 = vpop.f32.mrb[10].mxu0  ;;  %2859 = vmatprep.mubr.bf16.mxu1 %v889_v19  ;;  %v777_v17 = vadd.f32 %v3688_v47, %v776_v14  ;;  %v2830_v18 = vpop.f32.mrb[10].mxu1 }
 0x1ba   :  { %v612_v32 = vadd.f32 %v2786_v29, %v3688_v47  ;;  %v603_v33 = vpop.f32.mrb[11].mxu0  ;;  %2860 = vmatmul.mubr.bf16.gmra.mrb[24].mxu1 %v890_v15  ;;  %v833_v38 = vmax.f32 %v609_v23, 0.0  ;;  %v877_v21 = vmax.f32 %v785_v13, 0.0  ;;  %v788_v22 = vadd.f32 %v2830_v18, %v3688_v47  ;;  %v779_v23 = vpop.f32.mrb[11].mxu1 }
 0x1bb   :  { %v604_v36 = vadd.f32 %v3688_v47, %v603_v33  ;;  %v831_v41 = vmax.f32 %v601_v28, 0.0  ;;  %v875_v26 = vmax.f32 %v777_v17, 0.0  ;;  %v780_v27 = vadd.f32 %v3688_v47, %v779_v23 }
 0x1bc   :  { %v834_v39 = vmax.f32 %v612_v32, 0.0  ;;  %v878_v30 = vmax.f32 %v788_v22, 0.0 }
 0x1bd   :  { %v832_v42 = vmax.f32 %v604_v36, 0.0  ;;  %v876_v32 = vmax.f32 %v780_v27, 0.0 }
 0x1be   :  { %v892_v45 = vpack.c.bf16 %v834_v39, %v833_v38  ;;  %v3730_v35 = vpack.c.bf16 %v878_v30, %v877_v21 }
 0x1bf   :  { %v891_v50 = vpack.c.bf16 %v832_v42, %v831_v41  ;;  %v2789_v51 = vpop.f32.mrb[12].mxu0  ;;  %v3732_v38 = vpack.c.bf16 %v876_v32, %v875_v26  ;;  %v2833_v39 = vpop.f32.mrb[12].mxu1 }
 0x1c0   :  { %v625_v54 = vadd.f32 %v2789_v51, %v3688_v47  ;;  %v616_v55 = vpop.f32.mrb[13].mxu0  ;;  %v801_v42 = vadd.f32 %v2833_v39, %v3688_v47  ;;  %v792_v44 = vpop.f32.mrb[13].mxu1 }
 0x1c1   :  { %v617_v59 = vadd.f32 %v3688_v47, %v616_v55  ;;  %v2790_v60 = vpop.f32.mrb[14].mxu0  ;;  %2863 = vmatprep.mubr.bf16.mxu1 %v891_v50  ;;  %v793_v48 = vadd.f32 %v3688_v47, %v792_v44  ;;  %v2834_v49 = vpop.f32.mrb[14].mxu1 }
 0x1c2   :  { %v628_v63 = vadd.f32 %v2790_v60, %v3688_v47  ;;  %v619_v0 = vpop.f32.mrb[15].mxu0  ;;  %2864 = vmatmul.mubr.bf16.gmra.mrb[28].mxu1 %v892_v45  ;;  %v837_v5 = vmax.f32 %v625_v54, 0.0  ;;  %v881_v52 = vmax.f32 %v801_v42, 0.0  ;;  %v804_v53 = vadd.f32 %v2834_v49, %v3688_v47  ;;  %v795_v54 = vpop.f32.mrb[15].mxu1 }
 0x1c3   :  { %v620_v3 = vadd.f32 %v3688_v47, %v619_v0  ;;  %v835_v8 = vmax.f32 %v617_v59, 0.0  ;;  %v879_v57 = vmax.f32 %v793_v48, 0.0  ;;  %v796_v58 = vadd.f32 %v3688_v47, %v795_v54 }
 0x1c4   :  { %v838_v6 = vmax.f32 %v628_v63, 0.0  ;;  %v882_v61 = vmax.f32 %v804_v53, 0.0 }
 0x1c5   :  { %v836_v9 = vmax.f32 %v620_v3, 0.0  ;;  %v880_v63 = vmax.f32 %v796_v58, 0.0 }
 0x1c6   :  { %v894_v12 = vpack.c.bf16 %v838_v6, %v837_v5  ;;  %v3742_v2 = vpack.c.bf16 %v882_v61, %v881_v52 }
 0x1c7   :  { %v893_v15 = vpack.c.bf16 %v836_v9, %v835_v8  ;;  %v2793_v16 = vpop.f32.mrb[16].mxu0  ;;  %v3744_v5 = vpack.c.bf16 %v880_v63, %v879_v57  ;;  %v2837_v6 = vpop.f32.mrb[16].mxu1 }
 0x1c8   :  { %v641_v19 = vadd.f32 %v2793_v16, %v3688_v47  ;;  %v632_v20 = vpop.f32.mrb[17].mxu0  ;;  %v817_v9 = vadd.f32 %v2837_v6, %v3688_v47  ;;  %v808_v11 = vpop.f32.mrb[17].mxu1 }
 0x1c9   :  { %v633_v24 = vadd.f32 %v3688_v47, %v632_v20  ;;  %v2794_v25 = vpop.f32.mrb[18].mxu0  ;;  %2867 = vmatprep.mubr.bf16.mxu1 %v893_v15  ;;  %v809_v14 = vadd.f32 %v3688_v47, %v808_v11  ;;  %v2838_v15 = vpop.f32.mrb[18].mxu1 }
 0x1ca   :  { %v644_v28 = vadd.f32 %v2794_v25, %v3688_v47  ;;  %v635_v29 = vpop.f32.mrb[19].mxu0  ;;  %2868 = vmatmul.mubr.bf16.gmra.mrb[32].mxu1 %v894_v12  ;;  %v841_v33 = vmax.f32 %v641_v19, 0.0  ;;  %v885_v18 = vmax.f32 %v817_v9, 0.0  ;;  %v820_v19 = vadd.f32 %v2838_v15, %v3688_v47  ;;  %v811_v20 = vpop.f32.mrb[19].mxu1 }
 0x1cb   :  { %v636_v31 = vadd.f32 %v3688_v47, %v635_v29  ;;  %v839_v36 = vmax.f32 %v633_v24, 0.0  ;;  %v883_v23 = vmax.f32 %v809_v14, 0.0  ;;  %v812_v24 = vadd.f32 %v3688_v47, %v811_v20 }
 0x1cc   :  { %v842_v34 = vmax.f32 %v644_v28, 0.0  ;;  %v886_v27 = vmax.f32 %v820_v19, 0.0 }
 0x1cd   :  { %v840_v37 = vmax.f32 %v636_v31, 0.0  ;;  %v884_v29 = vmax.f32 %v812_v24, 0.0 }
 0x1ce   :  { %v896_v41 = vpack.c.bf16 %v842_v34, %v841_v33  ;;  %v3754_v32 = vpack.c.bf16 %v886_v27, %v885_v18 }
 0x1cf   :  { %v895_v45 = vpack.c.bf16 %v840_v37, %v839_v36  ;;  %v2797_v46 = vpop.f32.mrb[20].mxu0  ;;  %v3756_v36 = vpack.c.bf16 %v884_v29, %v883_v23 }
 0x1d0   :  { %v657_v50 = vadd.f32 %v2797_v46, %v3688_v47  ;;  %v648_v51 = vpop.f32.mrb[21].mxu0 }
 0x1d1   :  { %v649_v55 = vadd.f32 %v3688_v47, %v648_v51  ;;  %v2798_v56 = vpop.f32.mrb[22].mxu0  ;;  %2871 = vmatprep.mubr.bf16.mxu1 %v895_v45 }
 0x1d2   :  { %v660_v59 = vadd.f32 %v2798_v56, %v3688_v47  ;;  %v651_v60 = vpop.f32.mrb[23].mxu0  ;;  %2872 = vmatmul.mubr.bf16.gmra.mrb[36].mxu1 %v896_v41  ;;  %v845_v0 = vmax.f32 %v657_v50, 0.0 }
 0x1d3   :  { %v652_v62 = vadd.f32 %v3688_v47, %v651_v60  ;;  %v843_v3 = vmax.f32 %v649_v55, 0.0 }
 0x1d4   :  { %v846_v1 = vmax.f32 %v660_v59, 0.0 }
 0x1d5   :  { %v844_v4 = vmax.f32 %v652_v62, 0.0 }
 0x1d6   :  { %v898_v8 = vpack.c.bf16 %v846_v1, %v845_v0 }
 0x1d7   :  { %v897_v12 = vpack.c.bf16 %v844_v4, %v843_v3  ;;  %v2801_v13 = vpop.f32.mrb[24].mxu0 }
 0x1d8   :  { %v673_v16 = vadd.f32 %v2801_v13, %v3688_v47  ;;  %v664_v17 = vpop.f32.mrb[25].mxu0 }
 0x1d9   :  { %v665_v21 = vadd.f32 %v3688_v47, %v664_v17  ;;  %v2802_v22 = vpop.f32.mrb[26].mxu0  ;;  %2875 = vmatprep.mubr.bf16.mxu1 %v897_v12 }
 0x1da   :  { %v676_v25 = vadd.f32 %v2802_v22, %v3688_v47  ;;  %v667_v26 = vpop.f32.mrb[27].mxu0  ;;  %2876 = vmatmul.mubr.bf16.gmra.mrb[40].mxu1 %v898_v8  ;;  %v849_v30 = vmax.f32 %v673_v16, 0.0 }
 0x1db   :  { %v668_v28 = vadd.f32 %v3688_v47, %v667_v26  ;;  %v847_v33 = vmax.f32 %v665_v21, 0.0 }
 0x1dc   :  { %v850_v31 = vmax.f32 %v676_v25, 0.0 }
 0x1dd   :  { %v848_v34 = vmax.f32 %v668_v28, 0.0 }
 0x1de   :  { %v900_v37 = vpack.c.bf16 %v850_v31, %v849_v30 }
 0x1df   :  { %v899_v39 = vpack.c.bf16 %v848_v34, %v847_v33  ;;  %v2805_v41 = vpop.f32.mrb[28].mxu0 }
 0x1e0   :  { %v689_v42 = vadd.f32 %v2805_v41, %v3688_v47  ;;  %v680_v44 = vpop.f32.mrb[29].mxu0 }
 0x1e1   :  { %v681_v45 = vadd.f32 %v3688_v47, %v680_v44  ;;  %v2806_v46 = vpop.f32.mrb[30].mxu0  ;;  %2879 = vmatprep.mubr.bf16.mxu1 %v899_v39 }
 0x1e2   :  { %v692_v48 = vadd.f32 %v2806_v46, %v3688_v47  ;;  %v683_v49 = vpop.f32.mrb[31].mxu0  ;;  %2880 = vmatmul.mubr.bf16.gmra.mrb[44].mxu1 %v900_v37  ;;  %v853_v51 = vmax.f32 %v689_v42, 0.0 }
 0x1e3   :  { %v684_v50 = vadd.f32 %v3688_v47, %v683_v49  ;;  %v851_v53 = vmax.f32 %v681_v45, 0.0 }
 0x1e4   :  { %v854_v52 = vmax.f32 %v692_v48, 0.0 }
 0x1e5   :  { %v852_v54 = vmax.f32 %v684_v50, 0.0 }
 0x1e6   :  { %v902_v55 = vpack.c.bf16 %v854_v52, %v853_v51 }
 0x1e7   :  { %v901_v56 = vpack.c.bf16 %v852_v54, %v851_v53  ;;  %v2809_v57 = vpop.f32.mrb[32].mxu0 }
 0x1e8   :  { %v705_v58 = vadd.f32 %v2809_v57, %v3688_v47  ;;  %v696_v59 = vpop.f32.mrb[33].mxu0 }
 0x1e9   :  { %v697_v60 = vadd.f32 %v3688_v47, %v696_v59  ;;  %v2810_v61 = vpop.f32.mrb[34].mxu0  ;;  %2883 = vmatprep.mubr.bf16.mxu1 %v901_v56 }
 0x1ea   :  { %v708_v62 = vadd.f32 %v2810_v61, %v3688_v47  ;;  %v699_v63 = vpop.f32.mrb[35].mxu0  ;;  %2884 = vmatmul.mubr.bf16.gmra.mrb[48].mxu1 %v902_v55  ;;  %v857_v1 = vmax.f32 %v705_v58, 0.0 }
 0x1eb   :  { %v700_v0 = vadd.f32 %v3688_v47, %v699_v63  ;;  %v855_v4 = vmax.f32 %v697_v60, 0.0 }
 0x1ec   :  { %v858_v3 = vmax.f32 %v708_v62, 0.0 }
 0x1ed   :  { %v856_v6 = vmax.f32 %v700_v0, 0.0 }
 0x1ee   :  { %v904_v8 = vpack.c.bf16 %v858_v3, %v857_v1 }
 0x1ef   :  { %v903_v9 = vpack.c.bf16 %v856_v6, %v855_v4  ;;  %v2813_v11 = vpop.f32.mrb[36].mxu0 }
 0x1f0   :  { %v721_v12 = vadd.f32 %v2813_v11, %v3688_v47  ;;  %v712_v13 = vpop.f32.mrb[37].mxu0 }
 0x1f1   :  { %v713_v14 = vadd.f32 %v3688_v47, %v712_v13  ;;  %v2814_v15 = vpop.f32.mrb[38].mxu0  ;;  %2887 = vmatprep.mubr.bf16.mxu1 %v903_v9 }
 0x1f2   :  { %v724_v16 = vadd.f32 %v2814_v15, %v3688_v47  ;;  %v715_v17 = vpop.f32.mrb[39].mxu0  ;;  %2888 = vmatmul.mubr.bf16.gmra.mrb[52].mxu1 %v904_v8  ;;  %v861_v19 = vmax.f32 %v721_v12, 0.0 }
 0x1f3   :  { %v716_v18 = vadd.f32 %v3688_v47, %v715_v17  ;;  %v859_v21 = vmax.f32 %v713_v14, 0.0 }
 0x1f4   :  { %v862_v20 = vmax.f32 %v724_v16, 0.0 }
 0x1f5   :  { %v860_v22 = vmax.f32 %v716_v18, 0.0 }
 0x1f6   :  { %v906_v23 = vpack.c.bf16 %v862_v20, %v861_v19 }
 0x1f7   :  { %v905_v24 = vpack.c.bf16 %v860_v22, %v859_v21  ;;  %v2817_v25 = vpop.f32.mrb[40].mxu0 }
 0x1f8   :  { %v737_v26 = vadd.f32 %v2817_v25, %v3688_v47  ;;  %v728_v27 = vpop.f32.mrb[41].mxu0 }
 0x1f9   :  { %v729_v28 = vadd.f32 %v3688_v47, %v728_v27  ;;  %v2818_v29 = vpop.f32.mrb[42].mxu0  ;;  %2891 = vmatprep.mubr.bf16.mxu1 %v905_v24 }
 0x1fa   :  { %v740_v30 = vadd.f32 %v2818_v29, %v3688_v47  ;;  %v731_v31 = vpop.f32.mrb[43].mxu0  ;;  %2892 = vmatmul.mubr.bf16.gmra.mrb[56].mxu1 %v906_v23  ;;  %v865_v34 = vmax.f32 %v737_v26, 0.0 }
 0x1fb   :  { %v732_v33 = vadd.f32 %v3688_v47, %v731_v31  ;;  %v863_v39 = vmax.f32 %v729_v28, 0.0  ;;  %v3784_v47 = vld [vmem:[#allocation10] ss:$0 sm:$0xff] }
 0x1fc   :  { %v866_v37 = vmax.f32 %v740_v30, 0.0 }
 0x1fd   :  { %v864_v41 = vmax.f32 %v732_v33, 0.0 }
 0x1fe   :  { %v908_v42 = vpack.c.bf16 %v866_v37, %v865_v34 }
 0x1ff   :  { %v907_v44 = vpack.c.bf16 %v864_v41, %v863_v39 }
 0x201   :  { %2895 = vmatprep.mubr.bf16.mxu1 %v907_v44 }
 0x202   :  { %2896 = vmatmul.mubr.bf16.gmra.mrb[60].mxu1 %v908_v42 }
 0x203   :  { %2899 = vmatprep.mubr.bf16.mxu1 %v3708_v43 }
 0x20a   :  { %2900 = vmatmul.mubr.bf16.gmra.mrb[64].mxu1 %v3706_v40 }
 0x20b   :  { %2903 = vmatprep.mubr.bf16.mxu1 %v3720_v10 }
 0x212   :  { %2904 = vmatmul.mubr.bf16.gmra.mrb[68].mxu1 %v3718_v7 }
 0x213   :  { %2907 = vmatprep.mubr.bf16.mxu1 %v3732_v38 }
 0x21a   :  { %2908 = vmatmul.mubr.bf16.gmra.mrb[72].mxu1 %v3730_v35 }
 0x21b   :  { %2911 = vmatprep.mubr.bf16.mxu1 %v3744_v5 }
 0x222   :  { %2912 = vmatmul.mubr.bf16.gmra.mrb[76].mxu1 %v3742_v2 }
 0x223   :  { %2915 = vmatprep.mubr.bf16.mxu1 %v3756_v36 }
 0x22a   :  { %2916 = vmatmul.mubr.bf16.gmra.mrb[80].mxu1 %v3754_v32 }
 0x285   :  { %v2857_v43 = vpop.f32.mrb[20].mxu1 }
 0x286   :  { %v1033_v40 = vadd.f32 %v2857_v43, %v3784_v47  ;;  %v1024_v10 = vpop.f32.mrb[21].mxu1 }
 0x287   :  { %v1025_v7 = vadd.f32 %v3784_v47, %v1024_v10  ;;  %v2858_v45 = vpop.f32.mrb[22].mxu1 }
 0x288   :  { %v1036_v38 = vadd.f32 %v2858_v45, %v3784_v47  ;;  %v1027_v35 = vpop.f32.mrb[23].mxu1  ;;  %v1281_v46 = vmax.f32 %v1033_v40, 0.0 }
 0x289   :  { %v1028_v5 = vadd.f32 %v3784_v47, %v1027_v35  ;;  %v1279_v48 = vmax.f32 %v1025_v7, 0.0 }
 0x28a   :  { %v1282_v2 = vmax.f32 %v1036_v38, 0.0 }
 0x28b   :  { %v1280_v36 = vmax.f32 %v1028_v5, 0.0 }
 0x28c   :  { %v1344_v49 = vpack.c.bf16 %v1282_v2, %v1281_v46 }
 0x28d   :  { %v1343_v32 = vpack.c.bf16 %v1280_v36, %v1279_v48  ;;  %v2861_v50 = vpop.f32.mrb[24].mxu1 }
 0x28e   :  { %v1049_v51 = vadd.f32 %v2861_v50, %v3784_v47  ;;  %v1040_v52 = vpop.f32.mrb[25].mxu1 }
 0x28f   :  { %v1041_v53 = vadd.f32 %v3784_v47, %v1040_v52  ;;  %v2862_v54 = vpop.f32.mrb[26].mxu1  ;;  %2935 = vmatprep.mubr.bf16.mxu0 %v1343_v32 }
 0x290   :  { %v1052_v55 = vadd.f32 %v2862_v54, %v3784_v47  ;;  %v1043_v56 = vpop.f32.mrb[27].mxu1  ;;  %2936 = vmatmul.mubr.bf16.vlgmr.msra.gmra.mrb[44].mxu0 %v1344_v49  ;;  %v1285_v58 = vmax.f32 %v1049_v51, 0.0 }
 0x291   :  { %v1044_v57 = vadd.f32 %v3784_v47, %v1043_v56  ;;  %v1283_v60 = vmax.f32 %v1041_v53, 0.0 }
 0x292   :  { %v1286_v59 = vmax.f32 %v1052_v55, 0.0 }
 0x293   :  { %v1284_v61 = vmax.f32 %v1044_v57, 0.0 }
 0x294   :  { %v1346_v62 = vpack.c.bf16 %v1286_v59, %v1285_v58 }
 0x295   :  { %v1345_v63 = vpack.c.bf16 %v1284_v61, %v1283_v60  ;;  %v2865_v0 = vpop.f32.mrb[28].mxu1 }
 0x296   :  { %v1065_v1 = vadd.f32 %v2865_v0, %v3784_v47  ;;  %v1056_v3 = vpop.f32.mrb[29].mxu1 }
 0x297   :  { %v1057_v4 = vadd.f32 %v3784_v47, %v1056_v3  ;;  %v2866_v6 = vpop.f32.mrb[30].mxu1  ;;  %2939 = vmatprep.mubr.bf16.mxu0 %v1345_v63 }
 0x298   :  { %v1068_v8 = vadd.f32 %v2866_v6, %v3784_v47  ;;  %v1059_v9 = vpop.f32.mrb[31].mxu1  ;;  %2940 = vmatmul.mubr.bf16.gmra.mrb[48].mxu0 %v1346_v62  ;;  %v1289_v12 = vmax.f32 %v1065_v1, 0.0 }
 0x299   :  { %v1060_v11 = vadd.f32 %v3784_v47, %v1059_v9  ;;  %v1287_v14 = vmax.f32 %v1057_v4, 0.0 }
 0x29a   :  { %v1290_v13 = vmax.f32 %v1068_v8, 0.0 }
 0x29b   :  { %v1288_v15 = vmax.f32 %v1060_v11, 0.0 }
 0x29c   :  { %v1348_v16 = vpack.c.bf16 %v1290_v13, %v1289_v12 }
 0x29d   :  { %v1347_v17 = vpack.c.bf16 %v1288_v15, %v1287_v14  ;;  %v2869_v18 = vpop.f32.mrb[32].mxu1 }
 0x29e   :  { %v1081_v19 = vadd.f32 %v2869_v18, %v3784_v47  ;;  %v1072_v20 = vpop.f32.mrb[33].mxu1 }
 0x29f   :  { %v1073_v21 = vadd.f32 %v3784_v47, %v1072_v20  ;;  %v2870_v22 = vpop.f32.mrb[34].mxu1  ;;  %2943 = vmatprep.mubr.bf16.mxu0 %v1347_v17 }
 0x2a0   :  { %v1084_v23 = vadd.f32 %v2870_v22, %v3784_v47  ;;  %v1075_v24 = vpop.f32.mrb[35].mxu1  ;;  %2944 = vmatmul.mubr.bf16.gmra.mrb[52].mxu0 %v1348_v16  ;;  %v1293_v26 = vmax.f32 %v1081_v19, 0.0 }
 0x2a1   :  { %v1076_v25 = vadd.f32 %v3784_v47, %v1075_v24  ;;  %v1291_v28 = vmax.f32 %v1073_v21, 0.0 }
 0x2a2   :  { %v1294_v27 = vmax.f32 %v1084_v23, 0.0 }
 0x2a3   :  { %v1292_v29 = vmax.f32 %v1076_v25, 0.0 }
 0x2a4   :  { %v1350_v30 = vpack.c.bf16 %v1294_v27, %v1293_v26 }
 0x2a5   :  { %v1349_v31 = vpack.c.bf16 %v1292_v29, %v1291_v28  ;;  %v2873_v33 = vpop.f32.mrb[36].mxu1 }
 0x2a6   :  { %v1097_v34 = vadd.f32 %v2873_v33, %v3784_v47  ;;  %v1088_v37 = vpop.f32.mrb[37].mxu1 }
 0x2a7   :  { %v1089_v39 = vadd.f32 %v3784_v47, %v1088_v37  ;;  %v2874_v41 = vpop.f32.mrb[38].mxu1  ;;  %2947 = vmatprep.mubr.bf16.mxu0 %v1349_v31 }
 0x2a8   :  { %v1100_v42 = vadd.f32 %v2874_v41, %v3784_v47  ;;  %v1091_v44 = vpop.f32.mrb[39].mxu1  ;;  %2948 = vmatmul.mubr.bf16.gmra.mrb[56].mxu0 %v1350_v30  ;;  %v1297_v40 = vmax.f32 %v1097_v34, 0.0 }
 0x2a9   :  { %v1092_v43 = vadd.f32 %v3784_v47, %v1091_v44  ;;  %v1295_v7 = vmax.f32 %v1089_v39, 0.0 }
 0x2aa   :  { %v1298_v10 = vmax.f32 %v1100_v42, 0.0 }
 0x2ab   :  { %v1296_v45 = vmax.f32 %v1092_v43, 0.0 }
 0x2ac   :  { %v1352_v38 = vpack.c.bf16 %v1298_v10, %v1297_v40 }
 0x2ad   :  { %v1351_v35 = vpack.c.bf16 %v1296_v45, %v1295_v7  ;;  %v2877_v5 = vpop.f32.mrb[40].mxu1 }
 0x2ae   :  { %v1113_v46 = vadd.f32 %v2877_v5, %v3784_v47  ;;  %v1104_v2 = vpop.f32.mrb[41].mxu1 }
 0x2af   :  { %v1105_v48 = vadd.f32 %v3784_v47, %v1104_v2  ;;  %v2878_v36 = vpop.f32.mrb[42].mxu1  ;;  %2951 = vmatprep.mubr.bf16.mxu0 %v1351_v35 }
 0x2b0   :  { %v1116_v49 = vadd.f32 %v2878_v36, %v3784_v47  ;;  %v1107_v32 = vpop.f32.mrb[43].mxu1  ;;  %2952 = vmatmul.mubr.bf16.gmra.mrb[60].mxu0 %v1352_v38  ;;  %v1301_v51 = vmax.f32 %v1113_v46, 0.0 }
 0x2b1   :  { %v1108_v50 = vadd.f32 %v3784_v47, %v1107_v32  ;;  %v1299_v53 = vmax.f32 %v1105_v48, 0.0 }
 0x2b2   :  { %v1302_v52 = vmax.f32 %v1116_v49, 0.0 }
 0x2b3   :  { %v1300_v54 = vmax.f32 %v1108_v50, 0.0 }
 0x2b4   :  { %v1354_v55 = vpack.c.bf16 %v1302_v52, %v1301_v51 }
 0x2b5   :  { %v1353_v56 = vpack.c.bf16 %v1300_v54, %v1299_v53  ;;  %v2881_v57 = vpop.f32.mrb[44].mxu1 }
 0x2b6   :  { %v1129_v58 = vadd.f32 %v2881_v57, %v3784_v47  ;;  %v1120_v59 = vpop.f32.mrb[45].mxu1 }
 0x2b7   :  { %v1121_v60 = vadd.f32 %v3784_v47, %v1120_v59  ;;  %v2882_v61 = vpop.f32.mrb[46].mxu1  ;;  %2955 = vmatprep.mubr.bf16.mxu0 %v1353_v56 }
 0x2b8   :  { %v1132_v62 = vadd.f32 %v2882_v61, %v3784_v47  ;;  %v1123_v63 = vpop.f32.mrb[47].mxu1  ;;  %2956 = vmatmul.mubr.bf16.gmra.mrb[64].mxu0 %v1354_v55  ;;  %v1305_v1 = vmax.f32 %v1129_v58, 0.0 }
 0x2b9   :  { %v1124_v0 = vadd.f32 %v3784_v47, %v1123_v63  ;;  %v1303_v4 = vmax.f32 %v1121_v60, 0.0 }
 0x2ba   :  { %v1306_v3 = vmax.f32 %v1132_v62, 0.0 }
 0x2bb   :  { %v1304_v6 = vmax.f32 %v1124_v0, 0.0 }
 0x2bc   :  { %v1356_v8 = vpack.c.bf16 %v1306_v3, %v1305_v1 }
 0x2bd   :  { %v1355_v9 = vpack.c.bf16 %v1304_v6, %v1303_v4  ;;  %v2885_v11 = vpop.f32.mrb[48].mxu1 }
 0x2be   :  { %v1145_v12 = vadd.f32 %v2885_v11, %v3784_v47  ;;  %v1136_v13 = vpop.f32.mrb[49].mxu1 }
 0x2bf   :  { %v1137_v14 = vadd.f32 %v3784_v47, %v1136_v13  ;;  %v2886_v15 = vpop.f32.mrb[50].mxu1  ;;  %2959 = vmatprep.mubr.bf16.mxu0 %v1355_v9 }
 0x2c0   :  { %v1148_v16 = vadd.f32 %v2886_v15, %v3784_v47  ;;  %v1139_v17 = vpop.f32.mrb[51].mxu1  ;;  %2960 = vmatmul.mubr.bf16.gmra.mrb[68].mxu0 %v1356_v8  ;;  %v1309_v19 = vmax.f32 %v1145_v12, 0.0 }
 0x2c1   :  { %v1140_v18 = vadd.f32 %v3784_v47, %v1139_v17  ;;  %v1307_v21 = vmax.f32 %v1137_v14, 0.0 }
 0x2c2   :  { %v1310_v20 = vmax.f32 %v1148_v16, 0.0 }
 0x2c3   :  { %v1308_v22 = vmax.f32 %v1140_v18, 0.0 }
 0x2c4   :  { %v1358_v23 = vpack.c.bf16 %v1310_v20, %v1309_v19 }
 0x2c5   :  { %v1357_v24 = vpack.c.bf16 %v1308_v22, %v1307_v21  ;;  %v2889_v25 = vpop.f32.mrb[52].mxu1 }
 0x2c6   :  { %v1161_v26 = vadd.f32 %v2889_v25, %v3784_v47  ;;  %v1152_v27 = vpop.f32.mrb[53].mxu1 }
 0x2c7   :  { %v1153_v28 = vadd.f32 %v3784_v47, %v1152_v27  ;;  %v2890_v29 = vpop.f32.mrb[54].mxu1  ;;  %2963 = vmatprep.mubr.bf16.mxu0 %v1357_v24 }
 0x2c8   :  { %v1164_v30 = vadd.f32 %v2890_v29, %v3784_v47  ;;  %v1155_v31 = vpop.f32.mrb[55].mxu1  ;;  %2964 = vmatmul.mubr.bf16.gmra.mrb[72].mxu0 %v1358_v23  ;;  %v1313_v34 = vmax.f32 %v1161_v26, 0.0 }
 0x2c9   :  { %v1156_v33 = vadd.f32 %v3784_v47, %v1155_v31  ;;  %v1311_v39 = vmax.f32 %v1153_v28, 0.0 }
 0x2ca   :  { %v1314_v37 = vmax.f32 %v1164_v30, 0.0 }
 0x2cb   :  { %v1312_v41 = vmax.f32 %v1156_v33, 0.0 }
 0x2cc   :  { %v1360_v42 = vpack.c.bf16 %v1314_v37, %v1313_v34 }
 0x2cd   :  { %v1359_v44 = vpack.c.bf16 %v1312_v41, %v1311_v39  ;;  %v2893_v43 = vpop.f32.mrb[56].mxu1 }
 0x2ce   :  { %v1177_v40 = vadd.f32 %v2893_v43, %v3784_v47  ;;  %v1168_v10 = vpop.f32.mrb[57].mxu1 }
 0x2cf   :  { %v1169_v7 = vadd.f32 %v3784_v47, %v1168_v10  ;;  %v2894_v45 = vpop.f32.mrb[58].mxu1  ;;  %2967 = vmatprep.mubr.bf16.mxu0 %v1359_v44 }
 0x2d0   :  { %v1180_v38 = vadd.f32 %v2894_v45, %v3784_v47  ;;  %v1171_v35 = vpop.f32.mrb[59].mxu1  ;;  %2968 = vmatmul.mubr.bf16.gmra.mrb[76].mxu0 %v1360_v42  ;;  %v1317_v46 = vmax.f32 %v1177_v40, 0.0 }
 0x2d1   :  { %v1172_v5 = vadd.f32 %v3784_v47, %v1171_v35  ;;  %v1315_v48 = vmax.f32 %v1169_v7, 0.0 }
 0x2d2   :  { %v1318_v2 = vmax.f32 %v1180_v38, 0.0 }
 0x2d3   :  { %v1316_v36 = vmax.f32 %v1172_v5, 0.0 }
 0x2d4   :  { %v1362_v49 = vpack.c.bf16 %v1318_v2, %v1317_v46 }
 0x2d5   :  { %v1361_v32 = vpack.c.bf16 %v1316_v36, %v1315_v48  ;;  %v2897_v50 = vpop.f32.mrb[60].mxu1 }
 0x2d6   :  { %v1193_v51 = vadd.f32 %v2897_v50, %v3784_v47  ;;  %v1184_v52 = vpop.f32.mrb[61].mxu1 }
 0x2d7   :  { %v1185_v53 = vadd.f32 %v3784_v47, %v1184_v52  ;;  %v2898_v54 = vpop.f32.mrb[62].mxu1  ;;  %2971 = vmatprep.mubr.bf16.mxu0 %v1361_v32 }
 0x2d8   :  { %v1196_v55 = vadd.f32 %v2898_v54, %v3784_v47  ;;  %v1187_v56 = vpop.f32.mrb[63].mxu1  ;;  %2972 = vmatmul.mubr.bf16.gmra.mrb[80].mxu0 %v1362_v49  ;;  %v1321_v58 = vmax.f32 %v1193_v51, 0.0 }
 0x2d9   :  { %v1188_v57 = vadd.f32 %v3784_v47, %v1187_v56  ;;  %v1319_v60 = vmax.f32 %v1185_v53, 0.0 }
 0x2da   :  { %v1322_v59 = vmax.f32 %v1196_v55, 0.0 }
 0x2db   :  { %v1320_v61 = vmax.f32 %v1188_v57, 0.0 }
 0x2dc   :  { %v1364_v62 = vpack.c.bf16 %v1322_v59, %v1321_v58 }
 0x2dd   :  { %v1363_v63 = vpack.c.bf16 %v1320_v61, %v1319_v60  ;;  %v2901_v0 = vpop.f32.mrb[64].mxu1 }
 0x2de   :  { %v1209_v1 = vadd.f32 %v2901_v0, %v3784_v47  ;;  %v1200_v3 = vpop.f32.mrb[65].mxu1 }
 0x2df   :  { %v1201_v4 = vadd.f32 %v3784_v47, %v1200_v3  ;;  %v2902_v6 = vpop.f32.mrb[66].mxu1  ;;  %2975 = vmatprep.mubr.bf16.mxu0 %v1363_v63 }
 0x2e0   :  { %v1212_v8 = vadd.f32 %v2902_v6, %v3784_v47  ;;  %v1203_v9 = vpop.f32.mrb[67].mxu1  ;;  %2976 = vmatmul.mubr.bf16.gmra.mrb[84].mxu0 %v1364_v62  ;;  %v1325_v12 = vmax.f32 %v1209_v1, 0.0 }
 0x2e1   :  { %v1204_v11 = vadd.f32 %v3784_v47, %v1203_v9  ;;  %v1323_v14 = vmax.f32 %v1201_v4, 0.0 }
 0x2e2   :  { %v1326_v13 = vmax.f32 %v1212_v8, 0.0 }
 0x2e3   :  { %v1324_v15 = vmax.f32 %v1204_v11, 0.0  ;;  %v3113_v11 = vld [vmem:[#allocation14] sm:$0xff]  }
 0x2e4   :  { %v1366_v16 = vpack.c.bf16 %v1326_v13, %v1325_v12  ;;  %2999 = vmatprep.subr.bf16.mxu1 %v3113_v11  ;;  %v3114_v12 = vld [vmem:[#allocation14 + $0x8] sm:$0xff]   ;;  %v3115_v13 = vld [vmem:[#allocation14 + $0x10] sm:$0xff]  }
 0x2e5   :  { %v1365_v17 = vpack.c.bf16 %v1324_v15, %v1323_v14  ;;  %v2905_v18 = vpop.f32.mrb[68].mxu1  ;;  %3000 = vmatpush3.bf16.msra.mxu1 %v3113_v11  ;;  %v3116_v14 = vld [vmem:[#allocation14 + $0x18] sm:$0xff]  }
 0x2e6   :  { %v1225_v19 = vadd.f32 %v2905_v18, %v3784_v47  ;;  %v1216_v20 = vpop.f32.mrb[69].mxu1  ;;  %3001 = vmatprep.subr.bf16.mxu1 %v3114_v12  ;;  %v3850_v15 = vld [vmem:[#allocation13] ss:$0 sm:$0xff] }
 0x2e7   :  { %v1217_v21 = vadd.f32 %v3784_v47, %v1216_v20  ;;  %v2906_v22 = vpop.f32.mrb[70].mxu1  ;;  %2979 = vmatprep.mubr.bf16.mxu0 %v1365_v17 }
 0x2e8   :  { %v1228_v23 = vadd.f32 %v2906_v22, %v3784_v47  ;;  %v1219_v24 = vpop.f32.mrb[71].mxu1  ;;  %2980 = vmatmul.mubr.bf16.gmra.mrb[88].mxu0 %v1366_v16  ;;  %v1329_v26 = vmax.f32 %v1225_v19, 0.0 }
 0x2e9   :  { %v1220_v25 = vadd.f32 %v3784_v47, %v1219_v24  ;;  %v1327_v28 = vmax.f32 %v1217_v21, 0.0  ;;  %3002 = vmatpush3.bf16.msra.mxu1 %v3114_v12 }
 0x2ea   :  { %v1330_v27 = vmax.f32 %v1228_v23, 0.0  ;;  %3003 = vmatprep.subr.bf16.mxu1 %v3115_v13 }
 0x2eb   :  { %v1328_v29 = vmax.f32 %v1220_v25, 0.0 }
 0x2ec   :  { %v1368_v30 = vpack.c.bf16 %v1330_v27, %v1329_v26 }
 0x2ed   :  { %v1367_v31 = vpack.c.bf16 %v1328_v29, %v1327_v28  ;;  %v2909_v33 = vpop.f32.mrb[72].mxu1  ;;  %3004 = vmatpush3.bf16.msra.mxu1 %v3115_v13  ;;  %v3118_v28 = vld [vmem:[#allocation14 + $0x28] sm:$0xff]  }
 0x2ee   :  { %v1241_v34 = vadd.f32 %v2909_v33, %v3784_v47  ;;  %v1232_v37 = vpop.f32.mrb[73].mxu1  ;;  %3005 = vmatprep.subr.bf16.mxu1 %v3116_v14 }
 0x2ef   :  { %v1233_v39 = vadd.f32 %v3784_v47, %v1232_v37  ;;  %v2910_v41 = vpop.f32.mrb[74].mxu1  ;;  %2983 = vmatprep.mubr.bf16.mxu0 %v1367_v31 }
 0x2f0   :  { %v1244_v42 = vadd.f32 %v2910_v41, %v3784_v47  ;;  %v1235_v44 = vpop.f32.mrb[75].mxu1  ;;  %2984 = vmatmul.mubr.bf16.gmra.mrb[92].mxu0 %v1368_v30  ;;  %v1333_v40 = vmax.f32 %v1241_v34, 0.0 }
 0x2f1   :  { %v1236_v43 = vadd.f32 %v3784_v47, %v1235_v44  ;;  %v1331_v7 = vmax.f32 %v1233_v39, 0.0  ;;  %3006 = vmatpush3.bf16.msra.mxu1 %v3116_v14 }
 0x2f2   :  { %v1334_v10 = vmax.f32 %v1244_v42, 0.0 }
 0x2f3   :  { %v1332_v45 = vmax.f32 %v1236_v43, 0.0 }
 0x2f4   :  { %v1370_v38 = vpack.c.bf16 %v1334_v10, %v1333_v40 }
 0x2f5   :  { %v1369_v35 = vpack.c.bf16 %v1332_v45, %v1331_v7  ;;  %v2913_v5 = vpop.f32.mrb[76].mxu1 }
 0x2f6   :  { %v1257_v46 = vadd.f32 %v2913_v5, %v3784_v47  ;;  %v1248_v2 = vpop.f32.mrb[77].mxu1 }
 0x2f7   :  { %v1249_v48 = vadd.f32 %v3784_v47, %v1248_v2  ;;  %v2914_v36 = vpop.f32.mrb[78].mxu1  ;;  %2987 = vmatprep.mubr.bf16.mxu0 %v1369_v35 }
 0x2f8   :  { %v1260_v49 = vadd.f32 %v2914_v36, %v3784_v47  ;;  %v1251_v32 = vpop.f32.mrb[79].mxu1  ;;  %2988 = vmatmul.mubr.bf16.gmra.mrb[96].mxu0 %v1370_v38  ;;  %v1337_v51 = vmax.f32 %v1257_v46, 0.0 }
 0x2f9   :  { %v1252_v50 = vadd.f32 %v3784_v47, %v1251_v32  ;;  %v1335_v53 = vmax.f32 %v1249_v48, 0.0 }
 0x2fa   :  { %v1338_v52 = vmax.f32 %v1260_v49, 0.0 }
 0x2fb   :  { %v1336_v54 = vmax.f32 %v1252_v50, 0.0 }
 0x2fc   :  { %v1372_v55 = vpack.c.bf16 %v1338_v52, %v1337_v51 }
 0x2fd   :  { %v1371_v56 = vpack.c.bf16 %v1336_v54, %v1335_v53  ;;  %v2917_v57 = vpop.f32.mrb[80].mxu1 }
 0x2fe   :  { %v1273_v58 = vadd.f32 %v2917_v57, %v3784_v47  ;;  %v1264_v59 = vpop.f32.mrb[81].mxu1 }
 0x2ff   :  { %v1265_v60 = vadd.f32 %v3784_v47, %v1264_v59  ;;  %v2918_v61 = vpop.f32.mrb[82].mxu1  ;;  %2991 = vmatprep.mubr.bf16.mxu0 %v1371_v56 }
 0x300   :  { %v1276_v62 = vadd.f32 %v2918_v61, %v3784_v47  ;;  %v1267_v63 = vpop.f32.mrb[83].mxu1  ;;  %2992 = vmatmul.mubr.bf16.gmra.mrb[100].mxu0 %v1372_v55  ;;  %v1341_v1 = vmax.f32 %v1273_v58, 0.0 }
 0x301   :  { %v1268_v0 = vadd.f32 %v3784_v47, %v1267_v63  ;;  %v1339_v4 = vmax.f32 %v1265_v60, 0.0  ;;  %v3117_v47 = vld [vmem:[#allocation14 + $0x20] sm:$0xff]  }
 0x302   :  { %v1342_v3 = vmax.f32 %v1276_v62, 0.0  ;;  %3007 = vmatprep.subr.bf16.mxu1 %v3117_v47 }
 0x303   :  { %v1340_v6 = vmax.f32 %v1268_v0, 0.0  ;;  %3008 = vmatpush3.bf16.msra.mxu1 %v3117_v47 }
 0x304   :  { %v1374_v8 = vpack.c.bf16 %v1342_v3, %v1341_v1  ;;  %3009 = vmatprep.subr.bf16.mxu1 %v3118_v28 }
 0x305   :  { %v1373_v9 = vpack.c.bf16 %v1340_v6, %v1339_v4  ;;  %v3119_v4 = vld [vmem:[#allocation14 + $0x30] sm:$0xff]  }
 0x307   :  { %2995 = vmatprep.mubr.bf16.mxu0 %v1373_v9  ;;  %3010 = vmatpush3.bf16.msra.mxu1 %v3118_v28 }
 0x308   :  { %2996 = vmatmul.mubr.bf16.gmra.mrb[104].mxu0 %v1374_v8  ;;  %3011 = vmatprep.subr.bf16.mxu1 %v3119_v4 }
 0x30b   :  { %3012 = vmatpush3.bf16.msra.mxu1 %v3119_v4 }
 0x363   :  { %v2937_v16 = vpop.f32.mrb[44].mxu0 }
 0x364   :  { %v1489_v17 = vadd.f32 %v2937_v16, %v3850_v15  ;;  %v1480_v18 = vpop.f32.mrb[45].mxu0 }
 0x365   :  { %v1481_v19 = vadd.f32 %v3850_v15, %v1480_v18  ;;  %v2938_v20 = vpop.f32.mrb[46].mxu0 }
 0x366   :  { %v1492_v21 = vadd.f32 %v2938_v20, %v3850_v15  ;;  %v1483_v22 = vpop.f32.mrb[47].mxu0  ;;  %v1737_v24 = vmax.f32 %v1489_v17, 0.0 }
 0x367   :  { %v1484_v23 = vadd.f32 %v3850_v15, %v1483_v22  ;;  %v1735_v26 = vmax.f32 %v1481_v19, 0.0 }
 0x368   :  { %v1738_v25 = vmax.f32 %v1492_v21, 0.0 }
 0x369   :  { %v1736_v27 = vmax.f32 %v1484_v23, 0.0 }
 0x36a   :  { %v1800_v29 = vpack.c.bf16 %v1738_v25, %v1737_v24 }
 0x36b   :  { %v1799_v30 = vpack.c.bf16 %v1736_v27, %v1735_v26  ;;  %v2941_v31 = vpop.f32.mrb[48].mxu0 }
 0x36c   :  { %v1841_v33 = vunpack.i.l.bf16 %v1800_v29  ;;  %v1842_v34 = vunpack.i.h.bf16 %v1800_v29  ;;  %v1505_v37 = vadd.f32 %v2941_v31, %v3850_v15  ;;  %v1496_v39 = vpop.f32.mrb[49].mxu0 }
 0x36d   :  { %v1831_v41 = vunpack.i.l.bf16 %v1799_v30  ;;  %v1832_v42 = vunpack.i.h.bf16 %v1799_v30  ;;  %v1497_v44 = vadd.f32 %v3850_v15, %v1496_v39  ;;  %v2942_v43 = vpop.f32.mrb[50].mxu0 }
 0x36e   :  { %v1843_v40 = vmax.f32 %v1841_v33, %v1842_v34  ;;  %v1508_v10 = vadd.f32 %v2942_v43, %v3850_v15  ;;  %v1499_v7 = vpop.f32.mrb[51].mxu0  ;;  %v1741_v5 = vmax.f32 %v1505_v37, 0.0 }
 0x36f   :  { %v1833_v45 = vmax.f32 %v1831_v41, %v1832_v42  ;;  %v1500_v38 = vadd.f32 %v3850_v15, %v1499_v7  ;;  %v1739_v48 = vmax.f32 %v1497_v44, 0.0  ;;  %v3120_v41 = vld [vmem:[#allocation14 + $0x38] sm:$0xff]  }
 0x370   :  { %v1844_v35 = vrot.slane %v1843_v40, 4  ;;  %v1742_v46 = vmax.f32 %v1508_v10, 0.0  ;;  %3013 = vmatprep.subr.bf16.mxu1 %v3120_v41 }
 0x371   :  { %v1834_v2 = vrot.slane %v1833_v45, 4  ;;  %v1740_v36 = vmax.f32 %v1500_v38, 0.0  ;;  %3014 = vmatpush3.bf16.msra.mxu1 %v3120_v41 }
 0x372   :  { %v1845_v49 = vmax.f32 %v1843_v40, %v1844_v35  ;;  %v1802_v32 = vpack.c.bf16 %v1742_v46, %v1741_v5 }
 0x373   :  { %v1835_v50 = vmax.f32 %v1833_v45, %v1834_v2  ;;  %v1801_v51 = vpack.c.bf16 %v1740_v36, %v1739_v48  ;;  %v2945_v52 = vpop.f32.mrb[52].mxu0 }
 0x374   :  { %v1846_v53 = vrot.slane %v1845_v49, 2  ;;  %v1861_v54 = vunpack.i.l.bf16 %v1802_v32  ;;  %v1862_v55 = vunpack.i.h.bf16 %v1802_v32  ;;  %v1521_v56 = vadd.f32 %v2945_v52, %v3850_v15  ;;  %v1512_v57 = vpop.f32.mrb[53].mxu0 }
 0x375   :  { %v1836_v58 = vrot.slane %v1835_v50, 2  ;;  %v1851_v59 = vunpack.i.l.bf16 %v1801_v51  ;;  %v1852_v60 = vunpack.i.h.bf16 %v1801_v51  ;;  %v1513_v61 = vadd.f32 %v3850_v15, %v1512_v57  ;;  %v2946_v62 = vpop.f32.mrb[54].mxu0 }
 0x376   :  { %v1847_v63 = vmax.f32 %v1845_v49, %v1846_v53  ;;  %v1863_v0 = vmax.f32 %v1861_v54, %v1862_v55  ;;  %v1524_v1 = vadd.f32 %v2946_v62, %v3850_v15  ;;  %v1515_v3 = vpop.f32.mrb[55].mxu0  ;;  %v1745_v13 = vmax.f32 %v1521_v56, 0.0 }
 0x377   :  { %v1837_v6 = vmax.f32 %v1835_v50, %v1836_v58  ;;  %v1853_v8 = vmax.f32 %v1851_v59, %v1852_v60  ;;  %v1516_v9 = vadd.f32 %v3850_v15, %v1515_v3  ;;  %v1743_v17 = vmax.f32 %v1513_v61, 0.0  ;;  %v3869_v59 = vld [vmem:[#allocation17] sm:$0xff]  }
 0x378   :  { %v1848_v11 = vrot.slane %v1847_v63, 1  ;;  %v1864_v12 = vrot.slane %v1863_v0, 4  ;;  %v1746_v14 = vmax.f32 %v1524_v1, 0.0  ;;  %3019 = vmatprep.subr.bf16.mxu1 %v3869_v59 }
 0x379   :  { %v1838_v47 = vrot.slane %v1837_v6, 1  ;;  %v1854_v16 = vrot.slane %v1853_v8, 4  ;;  %v1744_v18 = vmax.f32 %v1516_v9, 0.0 }
 0x37a   :  { %v1849_v19 = vmax.f32 %v1847_v63, %v1848_v11  ;;  %v1865_v20 = vmax.f32 %v1863_v0, %v1864_v12  ;;  %v1804_v21 = vpack.c.bf16 %v1746_v14, %v1745_v13 }
 0x37b   :  { %v1839_v22 = vmax.f32 %v1837_v6, %v1838_v47  ;;  %v1855_v23 = vmax.f32 %v1853_v8, %v1854_v16  ;;  %v1803_v24 = vpack.c.bf16 %v1744_v18, %v1743_v17  ;;  %v2949_v25 = vpop.f32.mrb[56].mxu0 }
 0x37c   :  { %v1850_v26 = vpack.i.bf16 %v1849_v19, %v1849_v19  ;;  %v1866_v27 = vrot.slane %v1865_v20, 2  ;;  %v1881_v28 = vunpack.i.l.bf16 %v1804_v21  ;;  %v1882_v29 = vunpack.i.h.bf16 %v1804_v21  ;;  %v1528_v30 = vpop.f32.mrb[57].mxu0 }
 0x37d   :  { %v1840_v31 = vpack.i.bf16 %v1839_v22, %v1839_v22  ;;  %v1856_v33 = vrot.slane %v1855_v23, 2  ;;  %v1871_v34 = vunpack.i.l.bf16 %v1803_v24  ;;  %v1872_v37 = vunpack.i.h.bf16 %v1803_v24  ;;  %v2950_v39 = vpop.f32.mrb[58].mxu0 }
 0x37e   :  { %v2207_v42 = vunpack.c.l.b16 %v1850_v26  ;;  %v1867_v44 = vmax.f32 %v1865_v20, %v1866_v27  ;;  %v1883_v43 = vmax.f32 %v1881_v28, %v1882_v29  ;;  %v1537_v40 = vadd.f32 %v2949_v25, %v3850_v15  ;;  %v1531_v10 = vpop.f32.mrb[59].mxu0 }
 0x37f   :  { %v2206_v7 = vunpack.c.l.b16 %v1840_v31  ;;  %v1857_v45 = vmax.f32 %v1855_v23, %v1856_v33  ;;  %v1873_v38 = vmax.f32 %v1871_v34, %v1872_v37  ;;  %v1529_v35 = vadd.f32 %v3850_v15, %v1528_v30 }
 0x380   :  { %v1868_v5 = vrot.slane %v1867_v44, 1  ;;  %v1884_v46 = vrot.slane %v1883_v43, 4  ;;  %v1540_v2 = vadd.f32 %v2950_v39, %v3850_v15  ;;  %v1749_v49 = vmax.f32 %v1537_v40, 0.0 }
 0x381   :  { %v1858_v48 = vrot.slane %v1857_v45, 1  ;;  %v1874_v36 = vrot.slane %v1873_v38, 4  ;;  %v1532_v32 = vadd.f32 %v3850_v15, %v1531_v10  ;;  %v2239_v53 = vsel %vm2238_vm3, %v2207_v42, %v2206_v7 }
 0x382   :  { %v1869_v50 = vmax.f32 %v1867_v44, %v1868_v5  ;;  %v1885_v51 = vmax.f32 %v1883_v43, %v1884_v46  ;;  %v1750_v52 = vmax.f32 %v1540_v2, 0.0  ;;  %v1747_v56 = vmax.f32 %v1529_v35, 0.0 }
 0x383   :  { %v1859_v54 = vmax.f32 %v1857_v45, %v1858_v48  ;;  %v1875_v55 = vmax.f32 %v1873_v38, %v1874_v36  ;;  %v1748_v57 = vmax.f32 %v1532_v32, 0.0  ;;  %v2953_v58 = vpop.f32.mrb[60].mxu0 }
 0x384   :  { %v1870_v60 = vpack.i.bf16 %v1869_v50, %v1869_v50  ;;  %v1886_v61 = vrot.slane %v1885_v51, 2  ;;  %v1806_v62 = vpack.c.bf16 %v1750_v52, %v1749_v49  ;;  %v1553_v63 = vadd.f32 %v2953_v58, %v3850_v15  ;;  %v1544_v0 = vpop.f32.mrb[61].mxu0 }
 0x385   :  { %v1860_v1 = vpack.i.bf16 %v1859_v54, %v1859_v54  ;;  %v1876_v3 = vrot.slane %v1875_v55, 2  ;;  %v1805_v4 = vpack.c.bf16 %v1748_v57, %v1747_v56  ;;  %v2954_v6 = vpop.f32.mrb[62].mxu0  ;;  %v1545_v12 = vadd.f32 %v3850_v15, %v1544_v0 }
 0x386   :  { %v1887_v8 = vmax.f32 %v1885_v51, %v1886_v61  ;;  %v1901_v9 = vunpack.i.l.bf16 %v1806_v62  ;;  %v1902_v11 = vunpack.i.h.bf16 %v1806_v62  ;;  %v1547_v13 = vpop.f32.mrb[63].mxu0  ;;  %v2209_v18 = vunpack.c.l.b16 %v1870_v60 }
 0x387   :  { %v2208_v14 = vunpack.c.l.b16 %v1860_v1  ;;  %v1877_v47 = vmax.f32 %v1875_v55, %v1876_v3  ;;  %v1891_v16 = vunpack.i.l.bf16 %v1805_v4  ;;  %v1892_v17 = vunpack.i.h.bf16 %v1805_v4 }
 0x388   :  { %v1888_v19 = vrot.slane %v1887_v8, 1  ;;  %v1903_v20 = vmax.f32 %v1901_v9, %v1902_v11  ;;  %v1753_v21 = vmax.f32 %v1553_v63, 0.0  ;;  %v1556_v24 = vadd.f32 %v2954_v6, %v3850_v15 }
 0x389   :  { %v1878_v22 = vrot.slane %v1877_v47, 1  ;;  %v1893_v23 = vmax.f32 %v1891_v16, %v1892_v17  ;;  %v1548_v25 = vadd.f32 %v3850_v15, %v1547_v13  ;;  %v1751_v28 = vmax.f32 %v1545_v12, 0.0 }
 0x38a   :  { %v1889_v26 = vmax.f32 %v1887_v8, %v1888_v19  ;;  %v1904_v27 = vrot.slane %v1903_v20, 4  ;;  %v2241_v29 = vsel %vm2240_vm4, %v2208_v14, %v2239_v53  ;;  %v1754_v33 = vmax.f32 %v1556_v24, 0.0 }
 0x38b   :  { %v1879_v30 = vmax.f32 %v1877_v47, %v1878_v22  ;;  %v1894_v31 = vrot.slane %v1893_v23, 4  ;;  %v1752_v34 = vmax.f32 %v1548_v25, 0.0  ;;  %v2957_v37 = vpop.f32.mrb[64].mxu0  ;;  %v2243_v44 = vsel %vm2242_vm5, %v2209_v18, %v2241_v29 }
 0x38c   :  { %v1905_v39 = vmax.f32 %v1903_v20, %v1904_v27  ;;  %v1569_v41 = vadd.f32 %v2957_v37, %v3850_v15  ;;  %v1560_v42 = vpop.f32.mrb[65].mxu0  ;;  %v1808_v10 = vpack.c.bf16 %v1754_v33, %v1753_v21  ;;  %v1890_v38 = vpack.i.bf16 %v1889_v26, %v1889_v26 }
 0x38d   :  { %v1880_v43 = vpack.i.bf16 %v1879_v30, %v1879_v30  ;;  %v1895_v40 = vmax.f32 %v1893_v23, %v1894_v31  ;;  %v1807_v7 = vpack.c.bf16 %v1752_v34, %v1751_v28  ;;  %v2958_v45 = vpop.f32.mrb[66].mxu0  ;;  %v1561_v5 = vadd.f32 %v3850_v15, %v1560_v42 }
 0x38e   :  { %v1906_v35 = vrot.slane %v1905_v39, 2  ;;  %v1572_v46 = vadd.f32 %v2958_v45, %v3850_v15  ;;  %v1563_v2 = vpop.f32.mrb[67].mxu0  ;;  %v1921_v49 = vunpack.i.l.bf16 %v1808_v10  ;;  %v1922_v32 = vunpack.i.h.bf16 %v1808_v10 }
 0x38f   :  { %v2210_v48 = vunpack.c.l.b16 %v1880_v43  ;;  %v1896_v36 = vrot.slane %v1895_v40, 2  ;;  %v1911_v51 = vunpack.i.l.bf16 %v1807_v7  ;;  %v1912_v52 = vunpack.i.h.bf16 %v1807_v7 }
 0x390   :  { %v1907_v50 = vmax.f32 %v1905_v39, %v1906_v35  ;;  %v1757_v53 = vmax.f32 %v1569_v41, 0.0  ;;  %v1923_v55 = vmax.f32 %v1921_v49, %v1922_v32  ;;  %v1758_v56 = vmax.f32 %v1572_v46, 0.0 }
 0x391   :  { %v1897_v54 = vmax.f32 %v1895_v40, %v1896_v36  ;;  %v1564_v57 = vadd.f32 %v3850_v15, %v1563_v2  ;;  %v1913_v58 = vmax.f32 %v1911_v51, %v1912_v52  ;;  %v2211_v61 = vunpack.c.l.b16 %v1890_v38 }
 0x392   :  { %v1908_v60 = vrot.slane %v1907_v50, 1  ;;  %v2245_v62 = vsel %vm2244_vm6, %v2210_v48, %v2243_v44  ;;  %v1924_v63 = vrot.slane %v1923_v55, 4  ;;  %v1755_v0 = vmax.f32 %v1561_v5, 0.0 }
 0x393   :  { %v1810_v1 = vpack.c.bf16 %v1758_v56, %v1757_v53  ;;  %v1756_v3 = vmax.f32 %v1564_v57, 0.0  ;;  %v2961_v4 = vpop.f32.mrb[68].mxu0  ;;  %v1898_v6 = vrot.slane %v1897_v54, 1  ;;  %v1914_v8 = vrot.slane %v1913_v58, 4 }
 0x394   :  { %v1585_v9 = vadd.f32 %v2961_v4, %v3850_v15  ;;  %v1576_v11 = vpop.f32.mrb[69].mxu0  ;;  %v3885_v12 = vsel %vm2246_vm7, %v2211_v61, %v2245_v62  ;;  %v1925_v13 = vmax.f32 %v1923_v55, %v1924_v63  ;;  %v3889_v22 = vmax.f32 %v1907_v50, %v1908_v60 }
 0x395   :  { %v1941_v14 = vunpack.i.l.bf16 %v1810_v1  ;;  %v1942_v47 = vunpack.i.h.bf16 %v1810_v1  ;;  %v1809_v16 = vpack.c.bf16 %v1756_v3, %v1755_v0  ;;  %v2962_v17 = vpop.f32.mrb[70].mxu0  ;;  %v1915_v18 = vmax.f32 %v1913_v58, %v1914_v8 }
 0x396   :  { %v1577_v19 = vadd.f32 %v3850_v15, %v1576_v11  ;;  %v1588_v20 = vadd.f32 %v2962_v17, %v3850_v15  ;;  %v1579_v21 = vpop.f32.mrb[71].mxu0  ;;  %v1926_v23 = vrot.slane %v1925_v13, 2  ;;  %v1761_v28 = vmax.f32 %v1585_v9, 0.0 }
 0x397   :  { %v1943_v24 = vmax.f32 %v1941_v14, %v1942_v47  ;;  %v1931_v25 = vunpack.i.l.bf16 %v1809_v16  ;;  %v1932_v26 = vunpack.i.h.bf16 %v1809_v16  ;;  %v1916_v27 = vrot.slane %v1915_v18, 2 }
 0x398   :  { %v1762_v29 = vmax.f32 %v1588_v20, 0.0  ;;  %v1580_v30 = vadd.f32 %v3850_v15, %v1579_v21  ;;  %v1927_v31 = vmax.f32 %v1925_v13, %v1926_v23  ;;  %v1759_v37 = vmax.f32 %v1577_v19, 0.0 }
 0x399   :  { %v1944_v33 = vrot.slane %v1943_v24, 4  ;;  %v1933_v34 = vmax.f32 %v1931_v25, %v1932_v26  ;;  %v1917_v39 = vmax.f32 %v1915_v18, %v1916_v27  ;;  %v1899_v44 = vmax.f32 %v1897_v54, %v1898_v6 }
 0x39a   :  { %v1812_v41 = vpack.c.bf16 %v1762_v29, %v1761_v28  ;;  %v1760_v42 = vmax.f32 %v1580_v30, 0.0  ;;  %v1928_v43 = vrot.slane %v1927_v31, 1  ;;  %v1910_v45 = vpack.i.bf16 %v3889_v22, %v3889_v22 }
 0x39b   :  { %v1945_v40 = vmax.f32 %v1943_v24, %v1944_v33  ;;  %v1934_v10 = vrot.slane %v1933_v34, 4  ;;  %v2965_v7 = vpop.f32.mrb[72].mxu0  ;;  %v1918_v38 = vrot.slane %v1917_v39, 1  ;;  %v1900_v60 = vpack.i.bf16 %v1899_v44, %v1899_v44 }
 0x39c   :  { %v1961_v35 = vunpack.i.l.bf16 %v1812_v41  ;;  %v1962_v5 = vunpack.i.h.bf16 %v1812_v41  ;;  %v1811_v46 = vpack.c.bf16 %v1760_v42, %v1759_v37  ;;  %v1592_v2 = vpop.f32.mrb[73].mxu0  ;;  %v1929_v48 = vmax.f32 %v1927_v31, %v1928_v43 }
 0x39d   :  { %v1946_v36 = vrot.slane %v1945_v40, 2  ;;  %v1935_v49 = vmax.f32 %v1933_v34, %v1934_v10  ;;  %v1601_v32 = vadd.f32 %v2965_v7, %v3850_v15  ;;  %v2966_v50 = vpop.f32.mrb[74].mxu0  ;;  %v1919_v51 = vmax.f32 %v1917_v39, %v1918_v38 }
 0x39e   :  { %v1963_v52 = vmax.f32 %v1961_v35, %v1962_v5  ;;  %v1951_v53 = vunpack.i.l.bf16 %v1811_v46  ;;  %v1952_v54 = vunpack.i.h.bf16 %v1811_v46  ;;  %v1595_v55 = vpop.f32.mrb[75].mxu0  ;;  %v1930_v56 = vpack.i.bf16 %v1929_v48, %v1929_v48 }
 0x39f   :  { %v1947_v57 = vmax.f32 %v1945_v40, %v1946_v36  ;;  %v1936_v58 = vrot.slane %v1935_v49, 2  ;;  %v1920_v61 = vpack.i.bf16 %v1919_v51, %v1919_v51  ;;  %v1593_v0 = vadd.f32 %v3850_v15, %v1592_v2 }
 0x3a0   :  { %v1964_v62 = vrot.slane %v1963_v52, 4  ;;  %v1953_v63 = vmax.f32 %v1951_v53, %v1952_v54  ;;  %v1765_v4 = vmax.f32 %v1601_v32, 0.0  ;;  %v1604_v6 = vadd.f32 %v2966_v50, %v3850_v15 }
 0x3a1   :  { %v1948_v1 = vrot.slane %v1947_v57, 1  ;;  %v1937_v3 = vmax.f32 %v1935_v49, %v1936_v58  ;;  %v3897_v8 = vunpack.c.l.b16 %v1930_v56  ;;  %v3899_v9 = vunpack.c.l.b16 %v1920_v61 }
 0x3a2   :  { %v1965_v11 = vmax.f32 %v1963_v52, %v1964_v62  ;;  %v1954_v13 = vrot.slane %v1953_v63, 4  ;;  %v1766_v16 = vmax.f32 %v1604_v6, 0.0  ;;  %v1596_v17 = vadd.f32 %v3850_v15, %v1595_v55 }
 0x3a3   :  { %v1949_v14 = vmax.f32 %v1947_v57, %v1948_v1  ;;  %v1938_v47 = vrot.slane %v1937_v3, 1  ;;  %v2969_v18 = vpop.f32.mrb[76].mxu0  ;;  %v1763_v21 = vmax.f32 %v1593_v0, 0.0  ;;  %v2212_v37 = vunpack.c.l.b16 %v1900_v60 }
 0x3a4   :  { %v1966_v19 = vrot.slane %v1965_v11, 2  ;;  %v1955_v20 = vmax.f32 %v1953_v63, %v1954_v13  ;;  %v1617_v23 = vadd.f32 %v2969_v18, %v3850_v15  ;;  %v1608_v24 = vpop.f32.mrb[77].mxu0  ;;  %v1814_v27 = vpack.c.bf16 %v1766_v16, %v1765_v4 }
 0x3a5   :  { %v1950_v25 = vpack.i.bf16 %v1949_v14, %v1949_v14  ;;  %v1939_v26 = vmax.f32 %v1937_v3, %v1938_v47  ;;  %v1764_v28 = vmax.f32 %v1596_v17, 0.0  ;;  %v2970_v29 = vpop.f32.mrb[78].mxu0  ;;  %v1609_v33 = vadd.f32 %v3850_v15, %v1608_v24 }
 0x3a6   :  { %v1967_v30 = vmax.f32 %v1965_v11, %v1966_v19  ;;  %v1956_v31 = vrot.slane %v1955_v20, 2  ;;  %v1611_v34 = vpop.f32.mrb[79].mxu0  ;;  %v1981_v41 = vunpack.i.l.bf16 %v1814_v27  ;;  %v1982_v42 = vunpack.i.h.bf16 %v1814_v27 }
 0x3a7   :  { %v1940_v39 = vpack.i.bf16 %v1939_v26, %v1939_v26  ;;  %v1769_v44 = vmax.f32 %v1617_v23, 0.0  ;;  %v3904_v43 = vunpack.c.l.b16 %v1950_v25  ;;  %v1813_v7 = vpack.c.bf16 %v1764_v28, %v1763_v21 }
 0x3a8   :  { %v1968_v40 = vrot.slane %v1967_v30, 1  ;;  %v1957_v10 = vmax.f32 %v1955_v20, %v1956_v31  ;;  %v1983_v38 = vmax.f32 %v1981_v41, %v1982_v42  ;;  %v1767_v35 = vmax.f32 %v1609_v33, 0.0 }
 0x3a9   :  { %v1620_v5 = vadd.f32 %v2970_v29, %v3850_v15  ;;  %v1612_v46 = vadd.f32 %v3850_v15, %v1611_v34  ;;  %v1971_v36 = vunpack.i.l.bf16 %v1813_v7  ;;  %v1972_v49 = vunpack.i.h.bf16 %v1813_v7 }
 0x3aa   :  { %v1969_v2 = vmax.f32 %v1967_v30, %v1968_v40  ;;  %v1958_v48 = vrot.slane %v1957_v10, 1  ;;  %v3908_v32 = vunpack.c.l.b16 %v1940_v39  ;;  %v1984_v50 = vrot.slane %v1983_v38, 4 }
 0x3ab   :  { %v1770_v51 = vmax.f32 %v1620_v5, 0.0  ;;  %v1768_v52 = vmax.f32 %v1612_v46, 0.0  ;;  %v2973_v53 = vpop.f32.mrb[80].mxu0  ;;  %v1973_v55 = vmax.f32 %v1971_v36, %v1972_v49  ;;  %v2213_v58 = vunpack.c.l.b16 %v1910_v45 }
 0x3ac   :  { %v1959_v54 = vmax.f32 %v1957_v10, %v1958_v48  ;;  %v1633_v56 = vadd.f32 %v2973_v53, %v3850_v15  ;;  %v1624_v57 = vpop.f32.mrb[81].mxu0  ;;  %v1985_v60 = vmax.f32 %v1983_v38, %v1984_v50  ;;  %v1970_v1 = vpack.i.bf16 %v1969_v2, %v1969_v2 }
 0x3ad   :  { %v1816_v61 = vpack.c.bf16 %v1770_v51, %v1769_v44  ;;  %v1815_v62 = vpack.c.bf16 %v1768_v52, %v1767_v35  ;;  %v1625_v63 = vadd.f32 %v3850_v15, %v1624_v57  ;;  %v2974_v0 = vpop.f32.mrb[82].mxu0  ;;  %v1974_v4 = vrot.slane %v1973_v55, 4 }
 0x3ae   :  { %v1960_v3 = vpack.i.bf16 %v1959_v54, %v1959_v54  ;;  %v1636_v6 = vadd.f32 %v2974_v0, %v3850_v15  ;;  %v1627_v11 = vpop.f32.mrb[83].mxu0  ;;  %v1986_v13 = vrot.slane %v1985_v60, 2  ;;  %v1773_v18 = vmax.f32 %v1633_v56, 0.0 }
 0x3af   :  { %v2001_v14 = vunpack.i.l.bf16 %v1816_v61  ;;  %v2002_v47 = vunpack.i.h.bf16 %v1816_v61  ;;  %v1991_v16 = vunpack.i.l.bf16 %v1815_v62  ;;  %v1975_v22 = vmax.f32 %v1973_v55, %v1974_v4 }
 0x3b0   :  { %v3916_v17 = vunpack.c.l.b16 %v1960_v3  ;;  %v1992_v45 = vunpack.i.h.bf16 %v1815_v62  ;;  %v1771_v20 = vmax.f32 %v1625_v63, 0.0  ;;  %v1774_v21 = vmax.f32 %v1636_v6, 0.0 }
 0x3b1   :  { %v2003_v19 = vmax.f32 %v2001_v14, %v2002_v47  ;;  %v1628_v23 = vadd.f32 %v3850_v15, %v1627_v11  ;;  %v1987_v24 = vmax.f32 %v1985_v60, %v1986_v13  ;;  %v1976_v25 = vrot.slane %v1975_v22, 2 }
 0x3b2   :  { %v1993_v26 = vmax.f32 %v1991_v16, %v1992_v45  ;;  %v2249_v27 = vsel %vm2248_vm8, %v2212_v37, %v3885_v12  ;;  %v1818_v29 = vpack.c.bf16 %v1774_v21, %v1773_v18  ;;  %v3921_v33 = vunpack.c.l.b16 %v1970_v1 }
 0x3b3   :  { %v2004_v28 = vrot.slane %v2003_v19, 4  ;;  %v1772_v30 = vmax.f32 %v1628_v23, 0.0  ;;  %v2977_v31 = vpop.f32.mrb[84].mxu0  ;;  %v1977_v34 = vmax.f32 %v1975_v22, %v1976_v25  ;;  %v3925_v44 = vsel %vm2250_vm9, %v2213_v58, %v2249_v27 }
 0x3b4   :  { %v1994_v39 = vrot.slane %v1993_v26, 4  ;;  %v1649_v41 = vadd.f32 %v2977_v31, %v3850_v15  ;;  %v1640_v42 = vpop.f32.mrb[85].mxu0  ;;  %v2021_v10 = vunpack.i.l.bf16 %v1818_v29  ;;  %v2022_v7 = vunpack.i.h.bf16 %v1818_v29 }
 0x3b5   :  { %v2005_v40 = vmax.f32 %v2003_v19, %v2004_v28  ;;  %v1817_v38 = vpack.c.bf16 %v1772_v30, %v1771_v20  ;;  %v2978_v35 = vpop.f32.mrb[86].mxu0  ;;  %v1978_v12 = vrot.slane %v1977_v34, 1  ;;  %v1641_v5 = vadd.f32 %v3850_v15, %v1640_v42 }
 0x3b6   :  { %v1995_v37 = vmax.f32 %v1993_v26, %v1994_v39  ;;  %v1643_v46 = vpop.f32.mrb[87].mxu0  ;;  %v1988_v2 = vrot.slane %v1987_v24, 1  ;;  %v2023_v36 = vmax.f32 %v2021_v10, %v2022_v7  ;;  %v1777_v52 = vmax.f32 %v1649_v41, 0.0 }
 0x3b7   :  { %v2006_v48 = vrot.slane %v2005_v40, 2  ;;  %v2011_v49 = vunpack.i.l.bf16 %v1817_v38  ;;  %v2012_v50 = vunpack.i.h.bf16 %v1817_v38  ;;  %v1652_v53 = vadd.f32 %v2978_v35, %v3850_v15 }
 0x3b8   :  { %v1996_v51 = vrot.slane %v1995_v37, 2  ;;  %v1644_v54 = vadd.f32 %v3850_v15, %v1643_v46  ;;  %v2024_v56 = vrot.slane %v2023_v36, 4  ;;  %v1775_v58 = vmax.f32 %v1641_v5, 0.0 }
 0x3b9   :  { %v2007_v55 = vmax.f32 %v2005_v40, %v2006_v48  ;;  %v2013_v57 = vmax.f32 %v2011_v49, %v2012_v50  ;;  %v1778_v61 = vmax.f32 %v1652_v53, 0.0  ;;  %v1979_v63 = vmax.f32 %v1977_v34, %v1978_v12 }
 0x3ba   :  { %v1997_v60 = vmax.f32 %v1995_v37, %v1996_v51  ;;  %v1776_v62 = vmax.f32 %v1644_v54, 0.0  ;;  %v2025_v1 = vmax.f32 %v2023_v36, %v2024_v56  ;;  %v1989_v6 = vmax.f32 %v1987_v24, %v1988_v2 }
 0x3bb   :  { %v2008_v0 = vrot.slane %v2007_v55, 1  ;;  %v2014_v3 = vrot.slane %v2013_v57, 4  ;;  %v2981_v4 = vpop.f32.mrb[88].mxu0  ;;  %v1820_v13 = vpack.c.bf16 %v1778_v61, %v1777_v52  ;;  %v1980_v41 = vpack.i.bf16 %v1979_v63, %v1979_v63 }
 0x3bc   :  { %v1998_v11 = vrot.slane %v1997_v60, 1  ;;  %v1819_v14 = vpack.c.bf16 %v1776_v62, %v1775_v58  ;;  %v1665_v47 = vadd.f32 %v2981_v4, %v3850_v15  ;;  %v1656_v16 = vpop.f32.mrb[89].mxu0  ;;  %v2026_v45 = vrot.slane %v2025_v1, 2 }
 0x3bd   :  { %v2009_v22 = vmax.f32 %v2007_v55, %v2008_v0  ;;  %v2015_v18 = vmax.f32 %v2013_v57, %v2014_v3  ;;  %v3932_v19 = vadd.f32 %v3850_v15, %v1656_v16  ;;  %v2982_v20 = vpop.f32.mrb[90].mxu0  ;;  %v2041_v23 = vunpack.i.l.bf16 %v1820_v13 }
 0x3be   :  { %v1999_v21 = vmax.f32 %v1997_v60, %v1998_v11  ;;  %v2042_v25 = vunpack.i.h.bf16 %v1820_v13  ;;  %v2031_v26 = vunpack.i.l.bf16 %v1819_v14  ;;  %v1659_v27 = vpop.f32.mrb[91].mxu0  ;;  %v2027_v24 = vmax.f32 %v2025_v1, %v2026_v45 }
 0x3bf   :  { %v2010_v28 = vpack.i.bf16 %v2009_v22, %v2009_v22  ;;  %v2016_v29 = vrot.slane %v2015_v18, 2  ;;  %v2032_v30 = vunpack.i.h.bf16 %v1819_v14  ;;  %v1781_v39 = vmax.f32 %v1665_v47, 0.0 }
 0x3c0   :  { %v2000_v31 = vpack.i.bf16 %v1999_v21, %v1999_v21  ;;  %v2043_v34 = vmax.f32 %v2041_v23, %v2042_v25  ;;  %v2028_v40 = vrot.slane %v2027_v24, 1  ;;  %v1668_v12 = vadd.f32 %v2982_v20, %v3850_v15 }
 0x3c1   :  { %v2223_v42 = vunpack.c.l.b16 %v2010_v28  ;;  %v2017_v10 = vmax.f32 %v2015_v18, %v2016_v29  ;;  %v2033_v7 = vmax.f32 %v2031_v26, %v2032_v30  ;;  %v1990_v37 = vpack.i.bf16 %v1989_v6, %v1989_v6 }
 0x3c2   :  { %v2222_v38 = vunpack.c.l.b16 %v2000_v31  ;;  %v2044_v35 = vrot.slane %v2043_v34, 4  ;;  %v2029_v5 = vmax.f32 %v2027_v24, %v2028_v40  ;;  %v1779_v48 = vmax.f32 %v3932_v19, 0.0 }
 0x3c3   :  { %v2018_v46 = vrot.slane %v2017_v10, 1  ;;  %v2034_v2 = vrot.slane %v2033_v7, 4  ;;  %v2985_v36 = vpop.f32.mrb[92].mxu0  ;;  %v1782_v51 = vmax.f32 %v1668_v12, 0.0  ;;  %v2220_v52 = vunpack.c.l.b16 %v1980_v41 }
 0x3c4   :  { %v2259_v49 = vsel %vm2238_vm3, %v2223_v42, %v2222_v38  ;;  %v2045_v50 = vmax.f32 %v2043_v34, %v2044_v35  ;;  %v1672_v53 = vpop.f32.mrb[93].mxu0  ;;  %v2221_v56 = vunpack.c.l.b16 %v1990_v37  ;;  %v2252_v57 = vsel %vm2238_vm3, %v3897_v8, %v3899_v9 }
 0x3c5   :  { %v2019_v54 = vmax.f32 %v2017_v10, %v2018_v46  ;;  %v2035_v55 = vmax.f32 %v2033_v7, %v2034_v2  ;;  %v2986_v58 = vpop.f32.mrb[94].mxu0  ;;  %v1822_v61 = vpack.c.bf16 %v1782_v51, %v1781_v39  ;;  %v2253_v62 = vsel %vm2240_vm4, %v3908_v32, %v2252_v57 }
 0x3c6   :  { %v2046_v60 = vrot.slane %v2045_v50, 2  ;;  %v1660_v63 = vadd.f32 %v3850_v15, %v1659_v27  ;;  %v1675_v0 = vpop.f32.mrb[95].mxu0  ;;  %v2030_v1 = vpack.i.bf16 %v2029_v5, %v2029_v5  ;;  %v2254_v6 = vsel %vm2242_vm5, %v3904_v43, %v2253_v62 }
 0x3c7   :  { %v2020_v3 = vpack.i.bf16 %v2019_v54, %v2019_v54  ;;  %v2036_v4 = vrot.slane %v2035_v55, 2  ;;  %v2061_v13 = vunpack.i.l.bf16 %v1822_v61  ;;  %v2062_v14 = vunpack.i.h.bf16 %v1822_v61 }
 0x3c8   :  { %v2047_v11 = vmax.f32 %v2045_v50, %v2046_v60  ;;  %v2255_v8 = vsel %vm2244_vm6, %v3916_v17, %v2254_v6  ;;  %v1780_v16 = vmax.f32 %v1660_v63, 0.0  ;;  %v1681_v19 = vadd.f32 %v2985_v36, %v3850_v15 }
 0x3c9   :  { %v2224_v9 = vunpack.c.l.b16 %v2020_v3  ;;  %v2037_v47 = vmax.f32 %v2035_v55, %v2036_v4  ;;  %v2256_v32 = vsel %vm2246_vm7, %v3921_v33, %v2255_v8  ;;  %v2063_v45 = vmax.f32 %v2061_v13, %v2062_v14 }
 0x3ca   :  { %v2048_v22 = vrot.slane %v2047_v11, 1  ;;  %v2257_v18 = vsel %vm2248_vm8, %v2220_v52, %v2256_v32  ;;  %v1821_v23 = vpack.c.bf16 %v1780_v16, %v1779_v48  ;;  %v2225_v17 = vunpack.c.l.b16 %v2030_v1 }
 0x3cb   :  { %v2260_v43 = vsel %vm2240_vm4, %v2224_v9, %v2259_v49  ;;  %v2038_v20 = vrot.slane %v2037_v47, 1  ;;  %v2258_v21 = vsel %vm2250_vm9, %v2221_v56, %v2257_v18  ;;  %v2989_v25 = vpop.f32.mrb[96].mxu0  ;;  %v2064_v27 = vrot.slane %v2063_v45, 4 }
 0x3cc   :  { %v2049_v26 = vmax.f32 %v2047_v11, %v2048_v22  ;;  %v2273_v28 = vpack.c.b16 %v2258_v21, %v3925_v44  ;;  %v1688_v33 = vpop.f32.mrb[97].mxu0  ;;  %v2051_v29 = vunpack.i.l.bf16 %v1821_v23  ;;  %v2052_v30 = vunpack.i.h.bf16 %v1821_v23 }
 0x3cd   :  { %v2039_v24 = vmax.f32 %v2037_v47, %v2038_v20  ;;  %v1673_v31 = vadd.f32 %v3850_v15, %v1672_v53  ;;  %v2990_v34 = vpop.f32.mrb[98].mxu0  ;;  %v2065_v41 = vmax.f32 %v2063_v45, %v2064_v27  ;;  %v1684_v42 = vadd.f32 %v2986_v58, %v3850_v15 }
 0x3ce   :  { %v2050_v39 = vpack.i.bf16 %v2049_v26, %v2049_v26  ;;  %3015 = vmatprep.mubr.bf16.mxu1 %v2273_v28  ;;  %v1676_v40 = vadd.f32 %v3850_v15, %v1675_v0  ;;  %v1691_v10 = vpop.f32.mrb[99].mxu0  ;;  %v2053_v38 = vmax.f32 %v2051_v29, %v2052_v30  ;;  %v1785_v35 = vmax.f32 %v1681_v19, 0.0  ;;  %v3129_v30 = vld [vmem:[#allocation13] ss:$0 sm:$0xff] }
 0x3cf   :  { %v2040_v7 = vpack.i.bf16 %v2039_v24, %v2039_v24  ;;  %v1697_v44 = vadd.f32 %v2989_v25, %v3850_v15  ;;  %v2066_v12 = vrot.slane %v2065_v41, 2  ;;  %v1783_v37 = vmax.f32 %v1673_v31, 0.0 }
 0x3d0   :  { %v1786_v5 = vmax.f32 %v1684_v42, 0.0  ;;  %v1784_v46 = vmax.f32 %v1676_v40, 0.0  ;;  %v3958_v2 = vunpack.c.l.b16 %v2050_v39  ;;  %v2054_v48 = vrot.slane %v2053_v38, 4 }
 0x3d1   :  { %v1789_v36 = vmax.f32 %v1697_v44, 0.0  ;;  %v1689_v49 = vadd.f32 %v3850_v15, %v1688_v33  ;;  %v2067_v50 = vmax.f32 %v2065_v41, %v2066_v12  ;;  %v1700_v53 = vadd.f32 %v2990_v34, %v3850_v15 }
 0x3d2   :  { %v1824_v51 = vpack.c.bf16 %v1786_v5, %v1785_v35  ;;  %v1823_v52 = vpack.c.bf16 %v1784_v46, %v1783_v37  ;;  %v2055_v54 = vmax.f32 %v2053_v38, %v2054_v48  ;;  %v1692_v56 = vadd.f32 %v3850_v15, %v1691_v10 }
 0x3d3   :  { %v1787_v55 = vmax.f32 %v1689_v49, 0.0  ;;  %v2993_v57 = vpop.f32.mrb[100].mxu0  ;;  %v3964_v58 = vsel %vm2242_vm5, %v2225_v17, %v2260_v43  ;;  %v2068_v60 = vrot.slane %v2067_v50, 1  ;;  %v1790_v4 = vmax.f32 %v1700_v53, 0.0 }
 0x3d4   :  { %v2081_v61 = vunpack.i.l.bf16 %v1824_v51  ;;  %v2082_v62 = vunpack.i.h.bf16 %v1824_v51  ;;  %v2071_v63 = vunpack.i.l.bf16 %v1823_v52  ;;  %v1704_v0 = vpop.f32.mrb[101].mxu0  ;;  %v2056_v1 = vrot.slane %v2055_v54, 2 }
 0x3d5   :  { %v2072_v3 = vunpack.i.h.bf16 %v1823_v52  ;;  %v1788_v6 = vmax.f32 %v1692_v56, 0.0  ;;  %v2994_v11 = vpop.f32.mrb[102].mxu0  ;;  %v3966_v13 = vmax.f32 %v2067_v50, %v2068_v60  ;;  %v1713_v8 = vadd.f32 %v2993_v57, %v3850_v15 }
 0x3d6   :  { %v2083_v14 = vmax.f32 %v2081_v61, %v2082_v62  ;;  %v1705_v9 = vadd.f32 %v3850_v15, %v1704_v0  ;;  %v1707_v47 = vpop.f32.mrb[103].mxu0  ;;  %v2057_v32 = vmax.f32 %v2055_v54, %v2056_v1  ;;  %v1826_v22 = vpack.c.bf16 %v1790_v4, %v1789_v36 }
 0x3d7   :  { %v2073_v16 = vmax.f32 %v2071_v63, %v2072_v3  ;;  %v1825_v45 = vpack.c.bf16 %v1788_v6, %v1787_v55  ;;  %v3970_v18 = vunpack.c.l.b16 %v2040_v7  ;;  %v2070_v19 = vpack.i.bf16 %v3966_v13, %v3966_v13 }
 0x3d8   :  { %v2084_v43 = vrot.slane %v2083_v14, 4  ;;  %v1793_v20 = vmax.f32 %v1713_v8, 0.0  ;;  %v2058_v21 = vrot.slane %v2057_v32, 1  ;;  %v2101_v25 = vunpack.i.l.bf16 %v1826_v22 }
 0x3d9   :  { %v2074_v23 = vrot.slane %v2073_v16, 4  ;;  %v2102_v17 = vunpack.i.h.bf16 %v1826_v22  ;;  %v2091_v27 = vunpack.i.l.bf16 %v1825_v45  ;;  %v2092_v28 = vunpack.i.h.bf16 %v1825_v45 }
 0x3da   :  { %v2085_v26 = vmax.f32 %v2083_v14, %v2084_v43  ;;  %v1791_v15 = vmax.f32 %v1705_v9, 0.0  ;;  %v2059_v33 = vmax.f32 %v2057_v32, %v2058_v21  ;;  %v1716_v31 = vadd.f32 %v3129_v30, %v2994_v11 }
 0x3db   :  { %v2075_v24 = vmax.f32 %v2073_v16, %v2074_v23  ;;  %v2103_v29 = vmax.f32 %v2101_v25, %v2102_v17  ;;  %v2997_v34 = vpop.f32.mrb[104].mxu0  ;;  %v2093_v41 = vmax.f32 %v2091_v27, %v2092_v28  ;;  %v1708_v42 = vadd.f32 %v3129_v30, %v1707_v47 }
 0x3dc   :  { %v2086_v39 = vrot.slane %v2085_v26, 2  ;;  %v1729_v40 = vadd.f32 %v3129_v30, %v2997_v34  ;;  %v1720_v10 = vpop.f32.mrb[105].mxu0  ;;  %v2060_v7 = vpack.i.bf16 %v2059_v33, %v2059_v33  ;;  %v1794_v44 = vmax.f32 %v1716_v31, 0.0 }
 0x3dd   :  { %v2076_v38 = vrot.slane %v2075_v24, 2  ;;  %v2104_v35 = vrot.slane %v2103_v29, 4  ;;  %v2998_v12 = vpop.f32.mrb[106].mxu0  ;;  %v2094_v5 = vrot.slane %v2093_v41, 4  ;;  %v1792_v46 = vmax.f32 %v1708_v42, 0.0 }
 0x3de   :  { %v2087_v37 = vmax.f32 %v2085_v26, %v2086_v39  ;;  %v1797_v48 = vmax.f32 %v1729_v40, 0.0  ;;  %v1723_v36 = vpop.f32.mrb[107].mxu0  ;;  %v2228_v49 = vunpack.c.l.b16 %v2060_v7  ;;  %v1828_v52 = vpack.c.bf16 %v1794_v44, %v1793_v20 }
 0x3df   :  { %v2077_v50 = vmax.f32 %v2075_v24, %v2076_v38  ;;  %v2105_v51 = vmax.f32 %v2103_v29, %v2104_v35  ;;  %v2095_v54 = vmax.f32 %v2093_v41, %v2094_v5  ;;  %v1827_v55 = vpack.c.bf16 %v1792_v46, %v1791_v15 }
 0x3e0   :  { %v2088_v53 = vrot.slane %v2087_v37, 1  ;;  %v1721_v56 = vadd.f32 %v3129_v30, %v1720_v10  ;;  %v2121_v61 = vunpack.i.l.bf16 %v1828_v52  ;;  %v2122_v62 = vunpack.i.h.bf16 %v1828_v52 }
 0x3e1   :  { %v2078_v57 = vrot.slane %v2077_v50, 1  ;;  %v2106_v60 = vrot.slane %v2105_v51, 2  ;;  %v2096_v0 = vrot.slane %v2095_v54, 2  ;;  %v2111_v1 = vunpack.i.l.bf16 %v1827_v55 }
 0x3e2   :  { %v2089_v63 = vmax.f32 %v2087_v37, %v2088_v53  ;;  %v2112_v3 = vunpack.i.h.bf16 %v1827_v55  ;;  %v2123_v11 = vmax.f32 %v2121_v61, %v2122_v62  ;;  %v1795_v14 = vmax.f32 %v1721_v56, 0.0 }
 0x3e3   :  { %v2079_v4 = vmax.f32 %v2077_v50, %v2078_v57  ;;  %v2107_v6 = vmax.f32 %v2105_v51, %v2106_v60  ;;  %v2097_v9 = vmax.f32 %v2095_v54, %v2096_v0  ;;  %v1732_v32 = vadd.f32 %v3129_v30, %v2998_v12 }
 0x3e4   :  { %v2090_v8 = vpack.i.bf16 %v2089_v63, %v2089_v63  ;;  %v2113_v47 = vmax.f32 %v2111_v1, %v2112_v3  ;;  %v2124_v45 = vrot.slane %v2123_v11, 4  ;;  %v1724_v43 = vadd.f32 %v3129_v30, %v1723_v36 }
 0x3e5   :  { %v2080_v16 = vpack.i.bf16 %v2079_v4, %v2079_v4  ;;  %v2108_v22 = vrot.slane %v2107_v6, 1  ;;  %v2098_v21 = vrot.slane %v2097_v9, 1  ;;  %v1798_v25 = vmax.f32 %v1732_v32, 0.0 }
 0x3e6   :  { %v2231_v20 = vunpack.c.l.b16 %v2090_v8  ;;  %v2114_v23 = vrot.slane %v2113_v47, 4  ;;  %v2125_v27 = vmax.f32 %v2123_v11, %v2124_v45  ;;  %v1796_v28 = vmax.f32 %v1724_v43, 0.0 }
 0x3e7   :  { %v2230_v17 = vunpack.c.l.b16 %v2080_v16  ;;  %v2109_v26 = vmax.f32 %v2107_v6, %v2108_v22  ;;  %v2099_v15 = vmax.f32 %v2097_v9, %v2098_v21  ;;  %v1830_v24 = vpack.c.bf16 %v1798_v25, %v1797_v48  ;;  %v3123_v21 = vld [vmem:[#allocation17 + $0x10] sm:$0xff]   ;;  %v3125_v25 = vld [vmem:[#allocation17 + $0x20] sm:$0xff]  }
 0x3e8   :  { %v2115_v33 = vmax.f32 %v2113_v47, %v2114_v23  ;;  %v2262_v29 = vsel %vm2244_vm6, %v3970_v18, %v3964_v58  ;;  %v2126_v39 = vrot.slane %v2125_v27, 2  ;;  %v1829_v30 = vpack.c.bf16 %v1796_v28, %v1795_v14  ;;  %v3124_v23 = vld [vmem:[#allocation17 + $0x18] sm:$0xff]  }
 0x3e9   :  { %v2266_v31 = vsel %vm2238_vm3, %v2231_v20, %v2230_v17  ;;  %v2110_v34 = vpack.i.bf16 %v2109_v26, %v2109_v26  ;;  %v2100_v41 = vpack.i.bf16 %v2099_v15, %v2099_v15  ;;  %v2141_v40 = vunpack.i.l.bf16 %v1830_v24  ;;  %v3122_v20 = vld [vmem:[#allocation17 + $0x8] sm:$0xff]   ;;  %v3127_v26 = vld [vmem:[#allocation17 + $0x30] sm:$0xff]  }
 0x3ea   :  { %v2116_v42 = vrot.slane %v2115_v33, 2  ;;  %v2142_v10 = vunpack.i.h.bf16 %v1830_v24  ;;  %v2229_v7 = vunpack.c.l.b16 %v2070_v19  ;;  %v2127_v38 = vmax.f32 %v2125_v27, %v2126_v39  ;;  %v3126_v17 = vld [vmem:[#allocation17 + $0x28] sm:$0xff]   ;;  %v3128_v27 = vld [vmem:[#allocation17 + $0x38] sm:$0xff]  }
 0x3eb   :  { %v2131_v35 = vunpack.i.l.bf16 %v1829_v30  ;;  %v2132_v44 = vunpack.i.h.bf16 %v1829_v30  ;;  %v2232_v12 = vunpack.c.l.b16 %v2100_v41  ;;  %v2263_v58 = vsel %vm2246_vm7, %v3958_v2, %v2262_v29 }
 0x3ec   :  { %v2117_v37 = vmax.f32 %v2115_v33, %v2116_v42  ;;  %v2143_v5 = vmax.f32 %v2141_v40, %v2142_v10  ;;  %v2233_v18 = vunpack.c.l.b16 %v2110_v34  ;;  %v2128_v46 = vrot.slane %v2127_v38, 1 }
 0x3ed   :  { %v2133_v48 = vmax.f32 %v2131_v35, %v2132_v44  ;;  %v2264_v36 = vsel %vm2248_vm8, %v2228_v49, %v2263_v58  ;;  %v2267_v50 = vsel %vm2240_vm4, %v2232_v12, %v2266_v31 }
 0x3ee   :  { %v2118_v51 = vrot.slane %v2117_v37, 1  ;;  %v2144_v52 = vrot.slane %v2143_v5, 4  ;;  %v2265_v13 = vsel %vm2250_vm9, %v2229_v7, %v2264_v36  ;;  %v2129_v19 = vmax.f32 %v2127_v38, %v2128_v46  ;;  %v2625_v38 = vld [vmem:[#allocation19] ss:$0 sm:$0xff] }
 0x3ef   :  { %v2268_v53 = vsel %vm2242_vm5, %v2233_v18, %v2267_v50  ;;  %v2134_v54 = vrot.slane %v2133_v48, 4 }
 0x3f0   :  { %v2119_v55 = vmax.f32 %v2117_v37, %v2118_v51  ;;  %v2145_v56 = vmax.f32 %v2143_v5, %v2144_v52  ;;  %v2130_v57 = vpack.i.bf16 %v2129_v19, %v2129_v19 }
 0x3f1   :  { %v2135_v60 = vmax.f32 %v2133_v48, %v2134_v54 }
 0x3f2   :  { %v2120_v2 = vpack.i.bf16 %v2119_v55, %v2119_v55  ;;  %v2146_v61 = vrot.slane %v2145_v56, 2  ;;  %v2235_v49 = vunpack.c.l.b16 %v2130_v57 }
 0x3f3   :  { %v2136_v62 = vrot.slane %v2135_v60, 2 }
 0x3f4   :  { %v2234_v63 = vunpack.c.l.b16 %v2120_v2  ;;  %v2147_v0 = vmax.f32 %v2145_v56, %v2146_v61 }
 0x3f5   :  { %v2137_v1 = vmax.f32 %v2135_v60, %v2136_v62 }
 0x3f6   :  { %v2269_v3 = vsel %vm2244_vm6, %v2234_v63, %v2268_v53  ;;  %v2148_v4 = vrot.slane %v2147_v0, 1 }
 0x3f7   :  { %v2138_v6 = vrot.slane %v2137_v1, 1  ;;  %v2270_v11 = vsel %vm2246_vm7, %v2235_v49, %v2269_v3 }
 0x3f8   :  { %v2149_v14 = vmax.f32 %v2147_v0, %v2148_v4 }
 0x3f9   :  { %v2139_v8 = vmax.f32 %v2137_v1, %v2138_v6 }
 0x3fa   :  { %v2150_v9 = vpack.i.bf16 %v2149_v14, %v2149_v14 }
 0x3fb   :  { %v2140_v47 = vpack.i.bf16 %v2139_v8, %v2139_v8 }
 0x3fc   :  { %v2237_v16 = vunpack.c.l.b16 %v2150_v9 }
 0x3fd   :  { %v2236_v32 = vunpack.c.l.b16 %v2140_v47 }
 0x3ff   :  { %v2271_v22 = vsel %vm2248_vm8, %v2236_v32, %v2270_v11 }
 0x400   :  { %v2272_v45 = vsel %vm2250_vm9, %v2237_v16, %v2271_v22 }
 0x401   :  { %v2274_v43 = vpack.c.b16 %v2272_v45, %v2265_v13 }
 0x403   :  { %3016 = vmatmul.mubr.bf16.vlgmr.msra.gmra.mrb[84].mxu1 %v2274_v43 }
 0x404   :  { %3020 = vmatpush3.bf16.msra.mxu1 %v3869_v59  ;;  %v2616_v59 = vld [vmem:[#allocation16] ss:$0 sm:$0xff] }
 0x405   :  { %3021 = vmatprep.subr.bf16.mxu1 %v3122_v20 }
 0x408   :  { %3022 = vmatpush3.bf16.msra.mxu1 %v3122_v20 }
 0x409   :  { %3023 = vmatprep.subr.bf16.mxu1 %v3123_v21 }
 0x40c   :  { %3024 = vmatpush3.bf16.msra.mxu1 %v3123_v21 }
 0x40d   :  { %3025 = vmatprep.subr.bf16.mxu1 %v3124_v23 }
 0x410   :  { %3026 = vmatpush3.bf16.msra.mxu1 %v3124_v23 }
 0x411   :  { %3027 = vmatprep.subr.bf16.mxu1 %v3125_v25 }
 0x414   :  { %3028 = vmatpush3.bf16.msra.mxu1 %v3125_v25 }
 0x415   :  { %3029 = vmatprep.subr.bf16.mxu1 %v3126_v17 }
 0x418   :  { %3030 = vmatpush3.bf16.msra.mxu1 %v3126_v17 }
 0x419   :  { %3031 = vmatprep.subr.bf16.mxu1 %v3127_v26 }
 0x41c   :  { %3032 = vmatpush3.bf16.msra.mxu1 %v3127_v26 }
 0x41d   :  { %3033 = vmatprep.subr.bf16.mxu1 %v3128_v27 }
 0x420   :  { %3034 = vmatpush3.bf16.msra.mxu1 %v3128_v27 }
 0x4d6   :  { %v3017_v28 = vpop.f32.mrb[84].mxu1 }
 0x4d7   :  { %v2368_v15 = vadd.f32 %v3017_v28, %v2616_v59  ;;  %v2359_v33 = vpop.f32.mrb[85].mxu1 }
 0x4d8   :  { %v2360_v24 = vadd.f32 %v2616_v59, %v2359_v33  ;;  %v3018_v29 = vpop.f32.mrb[86].mxu1 }
 0x4d9   :  { %v2371_v31 = vadd.f32 %v3018_v29, %v2616_v59  ;;  %v2362_v34 = vpop.f32.mrb[87].mxu1  ;;  %v2376_v30 = vmax.f32 %v2368_v15, 0.0 }
 0x4da   :  { %v2363_v39 = vadd.f32 %v2616_v59, %v2362_v34  ;;  %v2374_v42 = vmax.f32 %v2360_v24, 0.0 }
 0x4db   :  { %v2377_v41 = vmax.f32 %v2371_v31, 0.0 }
 0x4dc   :  { %v2375_v40 = vmax.f32 %v2363_v39, 0.0 }
 0x4dd   :  { %v2379_v10 = vpack.c.bf16 %v2377_v41, %v2376_v30 }
 0x4de   :  { %v2378_v7 = vpack.c.bf16 %v2375_v40, %v2374_v42 }
 0x4e0   :  { %3035 = vmatprep.mubr.bf16.mxu1 %v2378_v7 }
 0x4e1   :  { %3036 = vmatmul.mubr.bf16.vlgmr.msra.gmra.mrb[88].mxu1 %v2379_v10 }
 0x5b4   :  { %v3037_v35 = vpop.f32.mrb[88].mxu1 }
 0x5b5   :  { %v2494_v44 = vadd.f32 %v3037_v35, %v2625_v38  ;;  %v2485_v12 = vpop.f32.mrb[89].mxu1 }
 0x5b6   :  { %v2486_v37 = vadd.f32 %v2625_v38, %v2485_v12  ;;  %v3038_v5 = vpop.f32.mrb[90].mxu1 }
 0x5b7   :  { %v2502_v58 = vmax.f32 %v2494_v44, 0.0  ;;  %v2497_v18 = vadd.f32 %v3038_v5, %v2625_v38  ;;  %v2488_v46 = vpop.f32.mrb[91].mxu1 }
 0x5b8   :  { %v2500_v48 = vmax.f32 %v2486_v37, 0.0  ;;  %v2489_v36 = vadd.f32 %v2625_v38, %v2488_v46 }
 0x5b9   :  { %2506 = vst [vmem:[#allocation20 + $0x10] sm:$0xff] %v2502_v58  ;;  %v2503_v50 = vmax.f32 %v2497_v18, 0.0 }
 0x5ba   :  { %2504 = vst [vmem:[#allocation20] sm:$0xff] %v2500_v48  ;;  %v2501_v51 = vmax.f32 %v2489_v36, 0.0 }
 0x5bb   :  { %2507 = vst [vmem:[#allocation20 + $0x18] sm:$0xff] %v2503_v50 }
 0x5bc   :  { %2505 = vst [vmem:[#allocation20 + $0x8] sm:$0xff] %v2501_v51 }
 0x5bd   :  { %3383 = shalt.err (!%p3380_p8)
}
 0x5be   :  { %s3384_s30 = scalar_lea.hbm %s4015_s11, 512 }
 0x5bf   :  { %p3385_p9 = scmp.ne.s32.totalorder %s4015_s11, %s3384_s30  ;;  %p3388_p10 = scmp.lt.u32.totalorder %s3384_s30, %s4015_s11 }
 0x5c1   :  { %p3390_p11 = pnand %p3388_p10, %p3385_p9 }
 0x5c3   :  { %3393 = shalt.err (!%p3390_p11)
}
 0x5c4   :  { %s3423_s26 = smov 128   ;;  %s3424_s28 = smov 8  }
 0x5c5   :  { %2519 = dma.vmem_to_hbm [thread:$0]  %s2514_s0, 512, %s4015_s11, [#allocation4], %s3423_s26, %s3423_s26, %s3424_s28  }
 0x5c6   :  { %3406 = dma.done.wait [#allocation4], 512  }
 0x5c7   :  { %3407 = vsyncadd [#allocation4], 4294966784 }
 0x5c8   :  { %2523 = vsyncpa [#allocation3], 1 }
 0x5c9   :  { %2524 = vsyncpa [#allocation6], 1 }
 0x5ca   :  { %2525 = vsyncpa [#allocation9], 1 }
 0x5cb   :  { %2526 = vsyncpa [#allocation12], 1 }
 0x5cc   :  { %2527 = vsyncpa [#allocation15], 1 }
 0x5cd   :  { %2528 = vsyncpa [#allocation18], 1 }
 0x5ce   :  { %2529 = vsyncpa [#allocation4], 1 }

</bundles_post_ra>
